<compile_context>
chip_gen: v7x
topology: tpu7x:2x2x1
jax: 0.10.0
libtpu: 0.0.40
codegen_flags: <defaults>
</compile_context>

<pallas_src>
import numpy as np
import jax
import jax.numpy as jnp
from jax.experimental import pallas as pl
from jax.experimental.pallas import tpu as pltpu


# --------------------------------------------------------------------------
# Pallas kernel: grid = (batch,); the forecast-window recurrence is a fully
# unrolled in-kernel loop with the hidden state carried as values (vregs).
# --------------------------------------------------------------------------
def gc_gru_kernel(slab_ref, xn0_ref, LT_ref, whhT_ref, bhn_ref,
                  wxn_ref, wgc_ref, wcx_ref, wfcT_ref, bfc_ref, out_ref):
    H = whhT_ref.shape[1]
    Tf = out_ref.shape[1]
    N = out_ref.shape[3]

    # Hoist per-batch constants into vregs once (reused every step).
    LT = LT_ref[...]          # (N, N)   scaled Laplacian, transposed
    whhT = whhT_ref[...]      # (3H, H)  fused hidden weights, transposed
    bhn = bhn_ref[...]        # (H, 1)
    wxn = wxn_ref[...]        # (3H, 1)  input-weight column for xn
    wgc = wgc_ref[...]        # (3H, 1)  input-weight column for x_gcn
    wcx = wcx_ref[...]        # (2, 1)   ChebConv coeffs of xn
    wfcT = wfcT_ref[...]      # (1, H)
    bfc = bfc_ref[...]        # (1, 1)

    h = jnp.zeros((H, N), jnp.float32)        # h0 = zeros
    xn = xn0_ref[0]                           # (1, N) = pm25_hist[:, -1]^T

    # forecast_window is small & static -> statically unrolled recurrence.
    for t in range(Tf):
        slab = slab_ref[0, t]                 # (3H+2, N) precomputed per step
        p = slab[:3 * H]                      # f @ W_ih[1:F+1] + fused biases
        q = slab[3 * H:3 * H + 2]             # [f@wc0[1:]+bc ; f@wc1[1:]]

        # ChebConv K=2 (sym norm, lambda_max=2), reassociated:
        #   u = x @ [wc0 | wc1]  ->  g = sigmoid(u0 + L @ u1 + bc)
        u = wcx * xn + q                                          # (2, N)
        Lu1 = jnp.dot(u[1:2], LT,
                      preferred_element_type=jnp.float32)         # (1, N)
        x_gcn = jax.nn.sigmoid(u[0:1] + Lu1)                      # (1, N)

        # Fused GRUCell (gate order r, z, n), transposed layout.
        gi = p + wxn * xn + wgc * x_gcn                           # (3H, N)
        gh = jnp.dot(whhT, h,
                     preferred_element_type=jnp.float32)          # (3H, N)
        r = jax.nn.sigmoid(gi[:H] + gh[:H])
        z = jax.nn.sigmoid(gi[H:2 * H] + gh[H:2 * H])
        n = jnp.tanh(gi[2 * H:] + r * (gh[2 * H:] + bhn))
        h = (1.0 - z) * n + z * h

        # fc_out: (1, H) @ (H, N) + bfc  -> lane-dense prediction row
        xn = jnp.dot(wfcT, h, preferred_element_type=jnp.float32) + bfc
        out_ref[0, t] = xn                    # (1, N) lane-dense store


# --------------------------------------------------------------------------
# Wrapper: host-side weight fusion + lane-dense projection precompute.
# --------------------------------------------------------------------------
def _const_spec(arr):
    zeros = (0,) * arr.ndim
    return pl.BlockSpec(arr.shape, lambda b, z=zeros: z)


def gc_gru_forward(feature, pm25_hist, params, L_hat,
                   hist_window, forecast_window):
    B, T, N, F = feature.shape
    H = params["whr"].shape[0]
    Tf = forecast_window
    dt = jnp.float32

    # ---- weight fusion (host side) ----------------------------------------
    W_ih = jnp.concatenate([params["wir"], params["wiz"], params["win"]], axis=1)  # (F+2, 3H)
    W_hh = jnp.concatenate([params["whr"], params["whz"], params["whn"]], axis=1)  # (H, 3H)
    bi = jnp.concatenate([params["bir"] + params["bhr"],
                          params["biz"] + params["bhz"],
                          params["bin"]], axis=1)                                   # (1, 3H)

    whhT = W_hh.T                               # (3H, H)
    wxn = W_ih[0:1, :].T                        # (3H, 1)  coeff of xn
    wgc = W_ih[F + 1:F + 2, :].T                # (3H, 1)  coeff of x_gcn
    bhn = params["bhn"].T                       # (H, 1)
    wcx = jnp.stack([params["wc0"][0], params["wc1"][0]])   # (2, 1)
    wfcT = params["wfc"].T                      # (1, H)
    bfc = params["bfc"]                         # (1, 1)
    LT = L_hat.T.astype(dt)                     # (N, N)

    # ---- recurrence-independent projection, all forecast steps at once ----
    feat_fut = feature[:, hist_window:hist_window + Tf]          # (B, Tf, N, F)
    P = jnp.einsum("btnf,fg->btgn", feat_fut, W_ih[1:1 + F, :])  # (B, Tf, 3H, N)
    P = P + bi[0][None, None, :, None]
    q0 = jnp.einsum("btnf,f->btn", feat_fut, params["wc0"][1:, 0]) + params["bc"][0, 0]
    q1 = jnp.einsum("btnf,f->btn", feat_fut, params["wc1"][1:, 0])
    slab = jnp.concatenate([P, q0[:, :, None, :], q1[:, :, None, :]],
                           axis=2).astype(dt)                    # (B, Tf, 3H+2, N)

    xn0 = jnp.transpose(pm25_hist[:, -1, :, 0:1], (0, 2, 1)).astype(dt)   # (B, 1, N)

    S = 3 * H + 2
    in_specs = [
        pl.BlockSpec((1, Tf, S, N), lambda b: (b, 0, 0, 0)),     # per-batch slab
        pl.BlockSpec((1, 1, N), lambda b: (b, 0, 0)),            # xn0 (per batch)
        _const_spec(LT), _const_spec(whhT), _const_spec(bhn),
        _const_spec(wxn), _const_spec(wgc), _const_spec(wcx),
        _const_spec(wfcT), _const_spec(bfc),
    ]

    out = pl.pallas_call(
        gc_gru_kernel,
        out_shape=jax.ShapeDtypeStruct((B, Tf, 1, N), dt),
        grid=(B,),
        in_specs=in_specs,
        out_specs=pl.BlockSpec((1, Tf, 1, N), lambda b: (b, 0, 0, 0)),
        compiler_params=pltpu.CompilerParams(
            dimension_semantics=("parallel",)),
    )(slab, xn0, LT, whhT, bhn, wxn, wgc, wcx, wfcT, bfc)

    return jnp.transpose(out, (0, 1, 3, 2))      # (B, forecast_window, N, 1)


# --------------------------------------------------------------------------
# Pure-JAX reference (mirrors the PyTorch forward, block-diagonal L)
# --------------------------------------------------------------------------
def gc_gru_reference(feature, pm25_hist, params, L_block,
                     hist_window, forecast_window):
    B, T, N, in_dim = feature.shape
    M = B * N
    H = params["whr"].shape[0]
    hn = jnp.zeros((M, H), jnp.float32)
    xn = pm25_hist[:, -1].reshape(M, 1)
    preds = []
    for i in range(forecast_window):
        f = feature[:, hist_window + i].reshape(M, in_dim)
        x = jnp.concatenate([xn, f], axis=-1)
        Lx = L_block @ x
        xg = jax.nn.sigmoid(x @ params["wc0"] + Lx @ params["wc1"] + params["bc"])
        xi = jnp.concatenate([x, xg], axis=-1)
        r = jax.nn.sigmoid(xi @ params["wir"] + params["bir"]
                           + hn @ params["whr"] + params["bhr"])
        z = jax.nn.sigmoid(xi @ params["wiz"] + params["biz"]
                           + hn @ params["whz"] + params["bhz"])
        n = jnp.tanh(xi @ params["win"] + params["bin"]
                     + r * (hn @ params["whn"] + params["bhn"]))
        hn = (1.0 - z) * n + z * hn
        xn = hn @ params["wfc"] + params["bfc"]
        preds.append(xn)
    out = jnp.stack(preds, axis=0).reshape(forecast_window, B, N, 1)
    return jnp.transpose(out, (1, 0, 2, 3))


# --------------------------------------------------------------------------
# Deterministic parameter init (shapes implied by the module's __init__)
# --------------------------------------------------------------------------
def init_params(key, in_dim, hid_dim):
    Fg = in_dim + 1        # ChebConv input dim  (in_dim + out_dim)
    Fr = Fg + 1            # GRU input dim       (in_dim + out_dim + gcn_out)
    H = hid_dim
    ks = jax.random.split(key, 20)

    def u(k, shape, fan_in):
        b = 1.0 / np.sqrt(fan_in)
        return jax.random.uniform(k, shape, jnp.float32, -b, b)

    return {
        # ChebConv(Fg, 1, K=2): two linear maps + bias (weights pre-transposed)
        "wc0": u(ks[0], (Fg, 1), Fg),
        "wc1": u(ks[1], (Fg, 1), Fg),
        "bc":  u(ks[2], (1, 1), Fg),
        # GRUCell(Fr, H): gate order r, z, n
        "wir": u(ks[3], (Fr, H), H), "wiz": u(ks[4], (Fr, H), H), "win": u(ks[5], (Fr, H), H),
        "bir": u(ks[6], (1, H), H),  "biz": u(ks[7], (1, H), H),  "bin": u(ks[8], (1, H), H),
        "whr": u(ks[9], (H, H), H),  "whz": u(ks[10], (H, H), H), "whn": u(ks[11], (H, H), H),
        "bhr": u(ks[12], (1, H), H), "bhz": u(ks[13], (1, H), H), "bhn": u(ks[14], (1, H), H),
        # fc_out: Linear(H, 1)
        "wfc": u(ks[15], (H, 1), H),
        "bfc": u(ks[16], (1, 1), H),
    }


def build_scaled_laplacian(adj_mat):
    """ChebConv(K=2, sym, lambda_max=2):  L_hat = -D^{-1/2} A D^{-1/2}."""
    A = adj_mat.astype(np.float32)
    deg = A.sum(axis=1)
    dinv = np.where(deg > 0, 1.0 / np.sqrt(np.maximum(deg, 1e-12)), 0.0)
    L_hat = -(dinv[:, None] * A * dinv[None, :])
    iso = deg == 0
    L_hat[iso, iso] = -1.0       # add_self_loops fill_value = -1 on isolated nodes
    return L_hat


# --------------------------------------------------------------------------
if __name__ == "__main__":
    B, N, in_dim, H = 2, 16, 4, 32          # batch, city_num, features, hid_dim
    hist_window, forecast_window = 6, 4
    T = hist_window + forecast_window

    key = jax.random.PRNGKey(0)
    k_feat, k_hist, k_param = jax.random.split(key, 3)

    feature = jax.random.normal(k_feat, (B, T, N, in_dim), jnp.float32)
    pm25_hist = jax.random.normal(k_hist, (B, hist_window, N, 1), jnp.float32)
    params = init_params(k_param, in_dim, H)

    # Deterministic ring adjacency over cities (symmetric, no self loops);
    # the torch module replicates it block-diagonally over the batch, which
    # the kernel exploits by working per-batch with the shared (N, N) L_hat.
    adj = np.zeros((N, N), dtype=bool)
    for i in range(N):
        adj[i, (i + 1) % N] = True
        adj[i, (i - 1) % N] = True
    L_hat_np = build_scaled_laplacian(adj)
    L_hat = jnp.asarray(L_hat_np)
    L_block = jnp.asarray(np.kron(np.eye(B, dtype=np.float32), L_hat_np))

    out = gc_gru_forward(feature, pm25_hist, params, L_hat,
                         hist_window, forecast_window)
    out = jax.block_until_ready(out)

    ref = gc_gru_reference(feature, pm25_hist, params, L_block,
                           hist_window, forecast_window)

    assert out.shape == (B, forecast_window, N, 1), out.shape
    assert np.allclose(np.asarray(out), np.asarray(ref), atol=1e-4, rtol=1e-4), \
        np.max(np.abs(np.asarray(out) - np.asarray(ref)))
    print("KERNEL_OK")
</pallas_src>

<mosaic_0001>
module attributes {stable_mosaic.version = 11 : i64} {
  func.func @gc_gru_kernel(%arg0: i32, %arg1: memref<1x4x98x16xf32, #tpu.memory_space<vmem>>, %arg2: memref<1x1x16xf32, #tpu.memory_space<vmem>>, %arg3: memref<16x16xf32, #tpu.memory_space<vmem>>, %arg4: memref<96x32xf32, #tpu.memory_space<vmem>>, %arg5: memref<32x1xf32, #tpu.memory_space<vmem>>, %arg6: memref<96x1xf32, #tpu.memory_space<vmem>>, %arg7: memref<96x1xf32, #tpu.memory_space<vmem>>, %arg8: memref<2x1xf32, #tpu.memory_space<vmem>>, %arg9: memref<1x32xf32, #tpu.memory_space<vmem>>, %arg10: memref<1x1xf32, #tpu.memory_space<vmem>>, %arg11: memref<1x4x1x16xf32, #tpu.memory_space<vmem>>) attributes {dimension_semantics = [#tpu.dimension_semantics<parallel>], iteration_bounds = array<i64: 2>, scalar_prefetch = 0 : i64, scratch_operands = 0 : i64, tpu.core_type = #tpu.core_type<tc>, window_params = [{transform_indices = @transform_0, window_bounds = array<i64: 1, 4, 98, 16>}, {transform_indices = @transform_1, window_bounds = array<i64: 1, 1, 16>}, {pipeline_mode = #tpu.pipeline_mode<synchronous>, transform_indices = @transform_2, window_bounds = array<i64: 16, 16>}, {pipeline_mode = #tpu.pipeline_mode<synchronous>, transform_indices = @transform_3, window_bounds = array<i64: 96, 32>}, {pipeline_mode = #tpu.pipeline_mode<synchronous>, transform_indices = @transform_4, window_bounds = array<i64: 32, 1>}, {pipeline_mode = #tpu.pipeline_mode<synchronous>, transform_indices = @transform_5, window_bounds = array<i64: 96, 1>}, {pipeline_mode = #tpu.pipeline_mode<synchronous>, transform_indices = @transform_6, window_bounds = array<i64: 96, 1>}, {pipeline_mode = #tpu.pipeline_mode<synchronous>, transform_indices = @transform_7, window_bounds = array<i64: 2, 1>}, {pipeline_mode = #tpu.pipeline_mode<synchronous>, transform_indices = @transform_8, window_bounds = array<i64: 1, 32>}, {pipeline_mode = #tpu.pipeline_mode<synchronous>, transform_indices = @transform_9, window_bounds = array<i64: 1, 1>}, {transform_indices = @transform_10, window_bounds = array<i64: 1, 4, 1, 16>}]} {
    %c0 = arith.constant 0 : index
    %c0_0 = arith.constant 0 : index
    %0 = vector.load %arg3[%c0, %c0_0] : memref<16x16xf32, #tpu.memory_space<vmem>>, vector<16x16xf32>
    %c0_1 = arith.constant 0 : index
    %c0_2 = arith.constant 0 : index
    %1 = vector.load %arg4[%c0_1, %c0_2] : memref<96x32xf32, #tpu.memory_space<vmem>>, vector<96x32xf32>
    %c0_3 = arith.constant 0 : index
    %c0_4 = arith.constant 0 : index
    %2 = vector.load %arg5[%c0_3, %c0_4] : memref<32x1xf32, #tpu.memory_space<vmem>>, vector<32x1xf32>
    %c0_5 = arith.constant 0 : index
    %c0_6 = arith.constant 0 : index
    %3 = vector.load %arg6[%c0_5, %c0_6] : memref<96x1xf32, #tpu.memory_space<vmem>>, vector<96x1xf32>
    %c0_7 = arith.constant 0 : index
    %c0_8 = arith.constant 0 : index
    %4 = vector.load %arg7[%c0_7, %c0_8] : memref<96x1xf32, #tpu.memory_space<vmem>>, vector<96x1xf32>
    %c0_9 = arith.constant 0 : index
    %c0_10 = arith.constant 0 : index
    %5 = vector.load %arg8[%c0_9, %c0_10] : memref<2x1xf32, #tpu.memory_space<vmem>>, vector<2x1xf32>
    %c0_11 = arith.constant 0 : index
    %c0_12 = arith.constant 0 : index
    %6 = vector.load %arg9[%c0_11, %c0_12] : memref<1x32xf32, #tpu.memory_space<vmem>>, vector<1x32xf32>
    %c0_13 = arith.constant 0 : index
    %c0_14 = arith.constant 0 : index
    %7 = vector.load %arg10[%c0_13, %c0_14] : memref<1x1xf32, #tpu.memory_space<vmem>>, vector<1x1xf32>
    %cst = arith.constant 0.000000e+00 : f32
    %8 = vector.broadcast %cst : f32 to vector<32x16xf32>
    %c0_15 = arith.constant 0 : index
    %c0_16 = arith.constant 0 : index
    %c0_17 = arith.constant 0 : index
    %9 = vector.load %arg2[%c0_15, %c0_16, %c0_17] : memref<1x1x16xf32, #tpu.memory_space<vmem>>, vector<1x1x16xf32>
    %10 = vector.shape_cast %9 : vector<1x1x16xf32> to vector<1x16xf32>
    %c0_18 = arith.constant 0 : index
    %c0_19 = arith.constant 0 : index
    %c0_20 = arith.constant 0 : index
    %c0_21 = arith.constant 0 : index
    %11 = vector.load %arg1[%c0_18, %c0_19, %c0_20, %c0_21] : memref<1x4x98x16xf32, #tpu.memory_space<vmem>>, vector<1x1x98x16xf32>
    %12 = vector.shape_cast %11 : vector<1x1x98x16xf32> to vector<98x16xf32>
    %13 = vector.extract_strided_slice %12 {offsets = [0, 0], sizes = [96, 16], strides = [1, 1]} : vector<98x16xf32> to vector<96x16xf32>
    %14 = vector.extract_strided_slice %12 {offsets = [96, 0], sizes = [2, 16], strides = [1, 1]} : vector<98x16xf32> to vector<2x16xf32>
    %15 = vector.broadcast %5 : vector<2x1xf32> to vector<2x16xf32>
    %16 = vector.broadcast %10 : vector<1x16xf32> to vector<2x16xf32>
    %17 = arith.mulf %15, %16 : vector<2x16xf32>
    %18 = arith.addf %17, %14 : vector<2x16xf32>
    %19 = vector.extract_strided_slice %18 {offsets = [1, 0], sizes = [1, 16], strides = [1, 1]} : vector<2x16xf32> to vector<1x16xf32>
    %cst_22 = arith.constant dense<0.000000e+00> : vector<1x16xf32>
    %20 = tpu.matmul %19, %0, %cst_22 {dimension_numbers = #tpu.dot_dimension_numbers<[1], [0], [0], [1], [0, 0, 1, 1], [], []>} : vector<1x16xf32>, vector<16x16xf32>, vector<1x16xf32> -> vector<1x16xf32>
    %21 = vector.extract_strided_slice %18 {offsets = [0, 0], sizes = [1, 16], strides = [1, 1]} : vector<2x16xf32> to vector<1x16xf32>
    %22 = arith.addf %21, %20 : vector<1x16xf32>
    %23 = arith.negf %22 : vector<1x16xf32>
    %24 = math.exp %23 : vector<1x16xf32>
    %cst_23 = arith.constant 1.000000e+00 : f32
    %25 = vector.broadcast %cst_23 : f32 to vector<1x16xf32>
    %26 = arith.addf %25, %24 : vector<1x16xf32>
    %27 = arith.divf %25, %26 : vector<1x16xf32>
    %28 = vector.broadcast %3 : vector<96x1xf32> to vector<96x16xf32>
    %29 = vector.broadcast %10 : vector<1x16xf32> to vector<96x16xf32>
    %30 = arith.mulf %28, %29 : vector<96x16xf32>
    %31 = arith.addf %13, %30 : vector<96x16xf32>
    %32 = vector.broadcast %4 : vector<96x1xf32> to vector<96x16xf32>
    %33 = vector.broadcast %27 : vector<1x16xf32> to vector<96x16xf32>
    %34 = arith.mulf %32, %33 : vector<96x16xf32>
    %35 = arith.addf %31, %34 : vector<96x16xf32>
    %cst_24 = arith.constant dense<0.000000e+00> : vector<96x16xf32>
    %36 = tpu.matmul %1, %8, %cst_24 {dimension_numbers = #tpu.dot_dimension_numbers<[1], [0], [0], [1], [0, 0, 1, 1], [], []>} : vector<96x32xf32>, vector<32x16xf32>, vector<96x16xf32> -> vector<96x16xf32>
    %37 = vector.extract_strided_slice %35 {offsets = [0, 0], sizes = [32, 16], strides = [1, 1]} : vector<96x16xf32> to vector<32x16xf32>
    %38 = vector.extract_strided_slice %36 {offsets = [0, 0], sizes = [32, 16], strides = [1, 1]} : vector<96x16xf32> to vector<32x16xf32>
    %39 = arith.addf %37, %38 : vector<32x16xf32>
    %40 = arith.negf %39 : vector<32x16xf32>
    %41 = math.exp %40 : vector<32x16xf32>
    %cst_25 = arith.constant 1.000000e+00 : f32
    %42 = vector.broadcast %cst_25 : f32 to vector<32x16xf32>
    %43 = arith.addf %42, %41 : vector<32x16xf32>
    %44 = arith.divf %42, %43 : vector<32x16xf32>
    %45 = vector.extract_strided_slice %35 {offsets = [32, 0], sizes = [32, 16], strides = [1, 1]} : vector<96x16xf32> to vector<32x16xf32>
    %46 = vector.extract_strided_slice %36 {offsets = [32, 0], sizes = [32, 16], strides = [1, 1]} : vector<96x16xf32> to vector<32x16xf32>
    %47 = arith.addf %45, %46 : vector<32x16xf32>
    %48 = arith.negf %47 : vector<32x16xf32>
    %49 = math.exp %48 : vector<32x16xf32>
    %cst_26 = arith.constant 1.000000e+00 : f32
    %50 = vector.broadcast %cst_26 : f32 to vector<32x16xf32>
    %51 = arith.addf %50, %49 : vector<32x16xf32>
    %52 = arith.divf %50, %51 : vector<32x16xf32>
    %53 = vector.extract_strided_slice %35 {offsets = [64, 0], sizes = [32, 16], strides = [1, 1]} : vector<96x16xf32> to vector<32x16xf32>
    %54 = vector.extract_strided_slice %36 {offsets = [64, 0], sizes = [32, 16], strides = [1, 1]} : vector<96x16xf32> to vector<32x16xf32>
    %55 = vector.broadcast %2 : vector<32x1xf32> to vector<32x16xf32>
    %56 = arith.addf %54, %55 : vector<32x16xf32>
    %57 = arith.mulf %44, %56 : vector<32x16xf32>
    %58 = arith.addf %53, %57 : vector<32x16xf32>
    %59 = math.tanh %58 : vector<32x16xf32>
    %cst_27 = arith.constant 1.000000e+00 : f32
    %60 = vector.broadcast %cst_27 : f32 to vector<32x16xf32>
    %61 = arith.subf %60, %52 : vector<32x16xf32>
    %62 = arith.mulf %61, %59 : vector<32x16xf32>
    %63 = arith.mulf %52, %8 : vector<32x16xf32>
    %64 = arith.addf %62, %63 : vector<32x16xf32>
    %cst_28 = arith.constant dense<0.000000e+00> : vector<1x16xf32>
    %65 = tpu.matmul %6, %64, %cst_28 {dimension_numbers = #tpu.dot_dimension_numbers<[1], [0], [0], [1], [0, 0, 1, 1], [], []>} : vector<1x32xf32>, vector<32x16xf32>, vector<1x16xf32> -> vector<1x16xf32>
    %66 = vector.broadcast %7 : vector<1x1xf32> to vector<1x16xf32>
    %67 = arith.addf %65, %66 : vector<1x16xf32>
    %c0_29 = arith.constant 0 : index
    %c0_30 = arith.constant 0 : index
    %c0_31 = arith.constant 0 : index
    %c0_32 = arith.constant 0 : index
    %68 = vector.load %arg11[%c0_29, %c0_30, %c0_31, %c0_32] : memref<1x4x1x16xf32, #tpu.memory_space<vmem>>, vector<1x1x1x16xf32>
    %69 = vector.shape_cast %68 : vector<1x1x1x16xf32> to vector<1x16xf32>
    %70 = vector.shape_cast %67 : vector<1x16xf32> to vector<1x1x1x16xf32>
    tpu.vector_store %arg11[%c0_29, %c0_30, %c0_31, %c0_32], %70 {strides = array<i32>} : memref<1x4x1x16xf32, #tpu.memory_space<vmem>>, vector<1x1x1x16xf32>,
    %c0_33 = arith.constant 0 : index
    %c1 = arith.constant 1 : index
    %c0_34 = arith.constant 0 : index
    %c0_35 = arith.constant 0 : index
    %71 = vector.load %arg1[%c0_33, %c1, %c0_34, %c0_35] : memref<1x4x98x16xf32, #tpu.memory_space<vmem>>, vector<1x1x98x16xf32>
    %72 = vector.shape_cast %71 : vector<1x1x98x16xf32> to vector<98x16xf32>
    %73 = vector.extract_strided_slice %72 {offsets = [0, 0], sizes = [96, 16], strides = [1, 1]} : vector<98x16xf32> to vector<96x16xf32>
    %74 = vector.extract_strided_slice %72 {offsets = [96, 0], sizes = [2, 16], strides = [1, 1]} : vector<98x16xf32> to vector<2x16xf32>
    %75 = vector.broadcast %5 : vector<2x1xf32> to vector<2x16xf32>
    %76 = vector.broadcast %67 : vector<1x16xf32> to vector<2x16xf32>
    %77 = arith.mulf %75, %76 : vector<2x16xf32>
    %78 = arith.addf %77, %74 : vector<2x16xf32>
    %79 = vector.extract_strided_slice %78 {offsets = [1, 0], sizes = [1, 16], strides = [1, 1]} : vector<2x16xf32> to vector<1x16xf32>
    %cst_36 = arith.constant dense<0.000000e+00> : vector<1x16xf32>
    %80 = tpu.matmul %79, %0, %cst_36 {dimension_numbers = #tpu.dot_dimension_numbers<[1], [0], [0], [1], [0, 0, 1, 1], [], []>} : vector<1x16xf32>, vector<16x16xf32>, vector<1x16xf32> -> vector<1x16xf32>
    %81 = vector.extract_strided_slice %78 {offsets = [0, 0], sizes = [1, 16], strides = [1, 1]} : vector<2x16xf32> to vector<1x16xf32>
    %82 = arith.addf %81, %80 : vector<1x16xf32>
    %83 = arith.negf %82 : vector<1x16xf32>
    %84 = math.exp %83 : vector<1x16xf32>
    %cst_37 = arith.constant 1.000000e+00 : f32
    %85 = vector.broadcast %cst_37 : f32 to vector<1x16xf32>
    %86 = arith.addf %85, %84 : vector<1x16xf32>
    %87 = arith.divf %85, %86 : vector<1x16xf32>
    %88 = vector.broadcast %3 : vector<96x1xf32> to vector<96x16xf32>
    %89 = vector.broadcast %67 : vector<1x16xf32> to vector<96x16xf32>
    %90 = arith.mulf %88, %89 : vector<96x16xf32>
    %91 = arith.addf %73, %90 : vector<96x16xf32>
    %92 = vector.broadcast %4 : vector<96x1xf32> to vector<96x16xf32>
    %93 = vector.broadcast %87 : vector<1x16xf32> to vector<96x16xf32>
    %94 = arith.mulf %92, %93 : vector<96x16xf32>
    %95 = arith.addf %91, %94 : vector<96x16xf32>
    %cst_38 = arith.constant dense<0.000000e+00> : vector<96x16xf32>
    %96 = tpu.matmul %1, %64, %cst_38 {dimension_numbers = #tpu.dot_dimension_numbers<[1], [0], [0], [1], [0, 0, 1, 1], [], []>} : vector<96x32xf32>, vector<32x16xf32>, vector<96x16xf32> -> vector<96x16xf32>
    %97 = vector.extract_strided_slice %95 {offsets = [0, 0], sizes = [32, 16], strides = [1, 1]} : vector<96x16xf32> to vector<32x16xf32>
    %98 = vector.extract_strided_slice %96 {offsets = [0, 0], sizes = [32, 16], strides = [1, 1]} : vector<96x16xf32> to vector<32x16xf32>
    %99 = arith.addf %97, %98 : vector<32x16xf32>
    %100 = arith.negf %99 : vector<32x16xf32>
    %101 = math.exp %100 : vector<32x16xf32>
    %cst_39 = arith.constant 1.000000e+00 : f32
    %102 = vector.broadcast %cst_39 : f32 to vector<32x16xf32>
    %103 = arith.addf %102, %101 : vector<32x16xf32>
    %104 = arith.divf %102, %103 : vector<32x16xf32>
    %105 = vector.extract_strided_slice %95 {offsets = [32, 0], sizes = [32, 16], strides = [1, 1]} : vector<96x16xf32> to vector<32x16xf32>
    %106 = vector.extract_strided_slice %96 {offsets = [32, 0], sizes = [32, 16], strides = [1, 1]} : vector<96x16xf32> to vector<32x16xf32>
    %107 = arith.addf %105, %106 : vector<32x16xf32>
    %108 = arith.negf %107 : vector<32x16xf32>
    %109 = math.exp %108 : vector<32x16xf32>
    %cst_40 = arith.constant 1.000000e+00 : f32
    %110 = vector.broadcast %cst_40 : f32 to vector<32x16xf32>
    %111 = arith.addf %110, %109 : vector<32x16xf32>
    %112 = arith.divf %110, %111 : vector<32x16xf32>
    %113 = vector.extract_strided_slice %95 {offsets = [64, 0], sizes = [32, 16], strides = [1, 1]} : vector<96x16xf32> to vector<32x16xf32>
    %114 = vector.extract_strided_slice %96 {offsets = [64, 0], sizes = [32, 16], strides = [1, 1]} : vector<96x16xf32> to vector<32x16xf32>
    %115 = vector.broadcast %2 : vector<32x1xf32> to vector<32x16xf32>
    %116 = arith.addf %114, %115 : vector<32x16xf32>
    %117 = arith.mulf %104, %116 : vector<32x16xf32>
    %118 = arith.addf %113, %117 : vector<32x16xf32>
    %119 = math.tanh %118 : vector<32x16xf32>
    %cst_41 = arith.constant 1.000000e+00 : f32
    %120 = vector.broadcast %cst_41 : f32 to vector<32x16xf32>
    %121 = arith.subf %120, %112 : vector<32x16xf32>
    %122 = arith.mulf %121, %119 : vector<32x16xf32>
    %123 = arith.mulf %112, %64 : vector<32x16xf32>
    %124 = arith.addf %122, %123 : vector<32x16xf32>
    %cst_42 = arith.constant dense<0.000000e+00> : vector<1x16xf32>
    %125 = tpu.matmul %6, %124, %cst_42 {dimension_numbers = #tpu.dot_dimension_numbers<[1], [0], [0], [1], [0, 0, 1, 1], [], []>} : vector<1x32xf32>, vector<32x16xf32>, vector<1x16xf32> -> vector<1x16xf32>
    %126 = vector.broadcast %7 : vector<1x1xf32> to vector<1x16xf32>
    %127 = arith.addf %125, %126 : vector<1x16xf32>
    %c0_43 = arith.constant 0 : index
    %c1_44 = arith.constant 1 : index
    %c0_45 = arith.constant 0 : index
    %c0_46 = arith.constant 0 : index
    %128 = vector.load %arg11[%c0_43, %c1_44, %c0_45, %c0_46] : memref<1x4x1x16xf32, #tpu.memory_space<vmem>>, vector<1x1x1x16xf32>
    %129 = vector.shape_cast %128 : vector<1x1x1x16xf32> to vector<1x16xf32>
    %130 = vector.shape_cast %127 : vector<1x16xf32> to vector<1x1x1x16xf32>
    tpu.vector_store %arg11[%c0_43, %c1_44, %c0_45, %c0_46], %130 {strides = array<i32>} : memref<1x4x1x16xf32, #tpu.memory_space<vmem>>, vector<1x1x1x16xf32>,
    %c0_47 = arith.constant 0 : index
    %c2 = arith.constant 2 : index
    %c0_48 = arith.constant 0 : index
    %c0_49 = arith.constant 0 : index
    %131 = vector.load %arg1[%c0_47, %c2, %c0_48, %c0_49] : memref<1x4x98x16xf32, #tpu.memory_space<vmem>>, vector<1x1x98x16xf32>
    %132 = vector.shape_cast %131 : vector<1x1x98x16xf32> to vector<98x16xf32>
    %133 = vector.extract_strided_slice %132 {offsets = [0, 0], sizes = [96, 16], strides = [1, 1]} : vector<98x16xf32> to vector<96x16xf32>
    %134 = vector.extract_strided_slice %132 {offsets = [96, 0], sizes = [2, 16], strides = [1, 1]} : vector<98x16xf32> to vector<2x16xf32>
    %135 = vector.broadcast %5 : vector<2x1xf32> to vector<2x16xf32>
    %136 = vector.broadcast %127 : vector<1x16xf32> to vector<2x16xf32>
    %137 = arith.mulf %135, %136 : vector<2x16xf32>
    %138 = arith.addf %137, %134 : vector<2x16xf32>
    %139 = vector.extract_strided_slice %138 {offsets = [1, 0], sizes = [1, 16], strides = [1, 1]} : vector<2x16xf32> to vector<1x16xf32>
    %cst_50 = arith.constant dense<0.000000e+00> : vector<1x16xf32>
    %140 = tpu.matmul %139, %0, %cst_50 {dimension_numbers = #tpu.dot_dimension_numbers<[1], [0], [0], [1], [0, 0, 1, 1], [], []>} : vector<1x16xf32>, vector<16x16xf32>, vector<1x16xf32> -> vector<1x16xf32>
    %141 = vector.extract_strided_slice %138 {offsets = [0, 0], sizes = [1, 16], strides = [1, 1]} : vector<2x16xf32> to vector<1x16xf32>
    %142 = arith.addf %141, %140 : vector<1x16xf32>
    %143 = arith.negf %142 : vector<1x16xf32>
    %144 = math.exp %143 : vector<1x16xf32>
    %cst_51 = arith.constant 1.000000e+00 : f32
    %145 = vector.broadcast %cst_51 : f32 to vector<1x16xf32>
    %146 = arith.addf %145, %144 : vector<1x16xf32>
    %147 = arith.divf %145, %146 : vector<1x16xf32>
    %148 = vector.broadcast %3 : vector<96x1xf32> to vector<96x16xf32>
    %149 = vector.broadcast %127 : vector<1x16xf32> to vector<96x16xf32>
    %150 = arith.mulf %148, %149 : vector<96x16xf32>
    %151 = arith.addf %133, %150 : vector<96x16xf32>
    %152 = vector.broadcast %4 : vector<96x1xf32> to vector<96x16xf32>
    %153 = vector.broadcast %147 : vector<1x16xf32> to vector<96x16xf32>
    %154 = arith.mulf %152, %153 : vector<96x16xf32>
    %155 = arith.addf %151, %154 : vector<96x16xf32>
    %cst_52 = arith.constant dense<0.000000e+00> : vector<96x16xf32>
    %156 = tpu.matmul %1, %124, %cst_52 {dimension_numbers = #tpu.dot_dimension_numbers<[1], [0], [0], [1], [0, 0, 1, 1], [], []>} : vector<96x32xf32>, vector<32x16xf32>, vector<96x16xf32> -> vector<96x16xf32>
    %157 = vector.extract_strided_slice %155 {offsets = [0, 0], sizes = [32, 16], strides = [1, 1]} : vector<96x16xf32> to vector<32x16xf32>
    %158 = vector.extract_strided_slice %156 {offsets = [0, 0], sizes = [32, 16], strides = [1, 1]} : vector<96x16xf32> to vector<32x16xf32>
    %159 = arith.addf %157, %158 : vector<32x16xf32>
    %160 = arith.negf %159 : vector<32x16xf32>
    %161 = math.exp %160 : vector<32x16xf32>
    %cst_53 = arith.constant 1.000000e+00 : f32
    %162 = vector.broadcast %cst_53 : f32 to vector<32x16xf32>
    %163 = arith.addf %162, %161 : vector<32x16xf32>
    %164 = arith.divf %162, %163 : vector<32x16xf32>
    %165 = vector.extract_strided_slice %155 {offsets = [32, 0], sizes = [32, 16], strides = [1, 1]} : vector<96x16xf32> to vector<32x16xf32>
    %166 = vector.extract_strided_slice %156 {offsets = [32, 0], sizes = [32, 16], strides = [1, 1]} : vector<96x16xf32> to vector<32x16xf32>
    %167 = arith.addf %165, %166 : vector<32x16xf32>
    %168 = arith.negf %167 : vector<32x16xf32>
    %169 = math.exp %168 : vector<32x16xf32>
    %cst_54 = arith.constant 1.000000e+00 : f32
    %170 = vector.broadcast %cst_54 : f32 to vector<32x16xf32>
    %171 = arith.addf %170, %169 : vector<32x16xf32>
    %172 = arith.divf %170, %171 : vector<32x16xf32>
    %173 = vector.extract_strided_slice %155 {offsets = [64, 0], sizes = [32, 16], strides = [1, 1]} : vector<96x16xf32> to vector<32x16xf32>
    %174 = vector.extract_strided_slice %156 {offsets = [64, 0], sizes = [32, 16], strides = [1, 1]} : vector<96x16xf32> to vector<32x16xf32>
    %175 = vector.broadcast %2 : vector<32x1xf32> to vector<32x16xf32>
    %176 = arith.addf %174, %175 : vector<32x16xf32>
    %177 = arith.mulf %164, %176 : vector<32x16xf32>
    %178 = arith.addf %173, %177 : vector<32x16xf32>
    %179 = math.tanh %178 : vector<32x16xf32>
    %cst_55 = arith.constant 1.000000e+00 : f32
    %180 = vector.broadcast %cst_55 : f32 to vector<32x16xf32>
    %181 = arith.subf %180, %172 : vector<32x16xf32>
    %182 = arith.mulf %181, %179 : vector<32x16xf32>
    %183 = arith.mulf %172, %124 : vector<32x16xf32>
    %184 = arith.addf %182, %183 : vector<32x16xf32>
    %cst_56 = arith.constant dense<0.000000e+00> : vector<1x16xf32>
    %185 = tpu.matmul %6, %184, %cst_56 {dimension_numbers = #tpu.dot_dimension_numbers<[1], [0], [0], [1], [0, 0, 1, 1], [], []>} : vector<1x32xf32>, vector<32x16xf32>, vector<1x16xf32> -> vector<1x16xf32>
    %186 = vector.broadcast %7 : vector<1x1xf32> to vector<1x16xf32>
    %187 = arith.addf %185, %186 : vector<1x16xf32>
    %c0_57 = arith.constant 0 : index
    %c2_58 = arith.constant 2 : index
    %c0_59 = arith.constant 0 : index
    %c0_60 = arith.constant 0 : index
    %188 = vector.load %arg11[%c0_57, %c2_58, %c0_59, %c0_60] : memref<1x4x1x16xf32, #tpu.memory_space<vmem>>, vector<1x1x1x16xf32>
    %189 = vector.shape_cast %188 : vector<1x1x1x16xf32> to vector<1x16xf32>
    %190 = vector.shape_cast %187 : vector<1x16xf32> to vector<1x1x1x16xf32>
    tpu.vector_store %arg11[%c0_57, %c2_58, %c0_59, %c0_60], %190 {strides = array<i32>} : memref<1x4x1x16xf32, #tpu.memory_space<vmem>>, vector<1x1x1x16xf32>,
    %c0_61 = arith.constant 0 : index
    %c3 = arith.constant 3 : index
    %c0_62 = arith.constant 0 : index
    %c0_63 = arith.constant 0 : index
    %191 = vector.load %arg1[%c0_61, %c3, %c0_62, %c0_63] : memref<1x4x98x16xf32, #tpu.memory_space<vmem>>, vector<1x1x98x16xf32>
    %192 = vector.shape_cast %191 : vector<1x1x98x16xf32> to vector<98x16xf32>
    %193 = vector.extract_strided_slice %192 {offsets = [0, 0], sizes = [96, 16], strides = [1, 1]} : vector<98x16xf32> to vector<96x16xf32>
    %194 = vector.extract_strided_slice %192 {offsets = [96, 0], sizes = [2, 16], strides = [1, 1]} : vector<98x16xf32> to vector<2x16xf32>
    %195 = vector.broadcast %5 : vector<2x1xf32> to vector<2x16xf32>
    %196 = vector.broadcast %187 : vector<1x16xf32> to vector<2x16xf32>
    %197 = arith.mulf %195, %196 : vector<2x16xf32>
    %198 = arith.addf %197, %194 : vector<2x16xf32>
    %199 = vector.extract_strided_slice %198 {offsets = [1, 0], sizes = [1, 16], strides = [1, 1]} : vector<2x16xf32> to vector<1x16xf32>
    %cst_64 = arith.constant dense<0.000000e+00> : vector<1x16xf32>
    %200 = tpu.matmul %199, %0, %cst_64 {dimension_numbers = #tpu.dot_dimension_numbers<[1], [0], [0], [1], [0, 0, 1, 1], [], []>} : vector<1x16xf32>, vector<16x16xf32>, vector<1x16xf32> -> vector<1x16xf32>
    %201 = vector.extract_strided_slice %198 {offsets = [0, 0], sizes = [1, 16], strides = [1, 1]} : vector<2x16xf32> to vector<1x16xf32>
    %202 = arith.addf %201, %200 : vector<1x16xf32>
    %203 = arith.negf %202 : vector<1x16xf32>
    %204 = math.exp %203 : vector<1x16xf32>
    %cst_65 = arith.constant 1.000000e+00 : f32
    %205 = vector.broadcast %cst_65 : f32 to vector<1x16xf32>
    %206 = arith.addf %205, %204 : vector<1x16xf32>
    %207 = arith.divf %205, %206 : vector<1x16xf32>
    %208 = vector.broadcast %3 : vector<96x1xf32> to vector<96x16xf32>
    %209 = vector.broadcast %187 : vector<1x16xf32> to vector<96x16xf32>
    %210 = arith.mulf %208, %209 : vector<96x16xf32>
    %211 = arith.addf %193, %210 : vector<96x16xf32>
    %212 = vector.broadcast %4 : vector<96x1xf32> to vector<96x16xf32>
    %213 = vector.broadcast %207 : vector<1x16xf32> to vector<96x16xf32>
    %214 = arith.mulf %212, %213 : vector<96x16xf32>
    %215 = arith.addf %211, %214 : vector<96x16xf32>
    %cst_66 = arith.constant dense<0.000000e+00> : vector<96x16xf32>
    %216 = tpu.matmul %1, %184, %cst_66 {dimension_numbers = #tpu.dot_dimension_numbers<[1], [0], [0], [1], [0, 0, 1, 1], [], []>} : vector<96x32xf32>, vector<32x16xf32>, vector<96x16xf32> -> vector<96x16xf32>
    %217 = vector.extract_strided_slice %215 {offsets = [0, 0], sizes = [32, 16], strides = [1, 1]} : vector<96x16xf32> to vector<32x16xf32>
    %218 = vector.extract_strided_slice %216 {offsets = [0, 0], sizes = [32, 16], strides = [1, 1]} : vector<96x16xf32> to vector<32x16xf32>
    %219 = arith.addf %217, %218 : vector<32x16xf32>
    %220 = arith.negf %219 : vector<32x16xf32>
    %221 = math.exp %220 : vector<32x16xf32>
    %cst_67 = arith.constant 1.000000e+00 : f32
    %222 = vector.broadcast %cst_67 : f32 to vector<32x16xf32>
    %223 = arith.addf %222, %221 : vector<32x16xf32>
    %224 = arith.divf %222, %223 : vector<32x16xf32>
    %225 = vector.extract_strided_slice %215 {offsets = [32, 0], sizes = [32, 16], strides = [1, 1]} : vector<96x16xf32> to vector<32x16xf32>
    %226 = vector.extract_strided_slice %216 {offsets = [32, 0], sizes = [32, 16], strides = [1, 1]} : vector<96x16xf32> to vector<32x16xf32>
    %227 = arith.addf %225, %226 : vector<32x16xf32>
    %228 = arith.negf %227 : vector<32x16xf32>
    %229 = math.exp %228 : vector<32x16xf32>
    %cst_68 = arith.constant 1.000000e+00 : f32
    %230 = vector.broadcast %cst_68 : f32 to vector<32x16xf32>
    %231 = arith.addf %230, %229 : vector<32x16xf32>
    %232 = arith.divf %230, %231 : vector<32x16xf32>
    %233 = vector.extract_strided_slice %215 {offsets = [64, 0], sizes = [32, 16], strides = [1, 1]} : vector<96x16xf32> to vector<32x16xf32>
    %234 = vector.extract_strided_slice %216 {offsets = [64, 0], sizes = [32, 16], strides = [1, 1]} : vector<96x16xf32> to vector<32x16xf32>
    %235 = vector.broadcast %2 : vector<32x1xf32> to vector<32x16xf32>
    %236 = arith.addf %234, %235 : vector<32x16xf32>
    %237 = arith.mulf %224, %236 : vector<32x16xf32>
    %238 = arith.addf %233, %237 : vector<32x16xf32>
    %239 = math.tanh %238 : vector<32x16xf32>
    %cst_69 = arith.constant 1.000000e+00 : f32
    %240 = vector.broadcast %cst_69 : f32 to vector<32x16xf32>
    %241 = arith.subf %240, %232 : vector<32x16xf32>
    %242 = arith.mulf %241, %239 : vector<32x16xf32>
    %243 = arith.mulf %232, %184 : vector<32x16xf32>
    %244 = arith.addf %242, %243 : vector<32x16xf32>
    %cst_70 = arith.constant dense<0.000000e+00> : vector<1x16xf32>
    %245 = tpu.matmul %6, %244, %cst_70 {dimension_numbers = #tpu.dot_dimension_numbers<[1], [0], [0], [1], [0, 0, 1, 1], [], []>} : vector<1x32xf32>, vector<32x16xf32>, vector<1x16xf32> -> vector<1x16xf32>
    %246 = vector.broadcast %7 : vector<1x1xf32> to vector<1x16xf32>
    %247 = arith.addf %245, %246 : vector<1x16xf32>
    %c0_71 = arith.constant 0 : index
    %c3_72 = arith.constant 3 : index
    %c0_73 = arith.constant 0 : index
    %c0_74 = arith.constant 0 : index
    %248 = vector.load %arg11[%c0_71, %c3_72, %c0_73, %c0_74] : memref<1x4x1x16xf32, #tpu.memory_space<vmem>>, vector<1x1x1x16xf32>
    %249 = vector.shape_cast %248 : vector<1x1x1x16xf32> to vector<1x16xf32>
    %250 = vector.shape_cast %247 : vector<1x16xf32> to vector<1x1x1x16xf32>
    tpu.vector_store %arg11[%c0_71, %c3_72, %c0_73, %c0_74], %250 {strides = array<i32>} : memref<1x4x1x16xf32, #tpu.memory_space<vmem>>, vector<1x1x1x16xf32>,
    return
  }
  func.func @transform_0(%arg0: i32) -> (i32, i32, i32, i32) {
    %c0_i32 = arith.constant 0 : i32
    %c0_i32_0 = arith.constant 0 : i32
    %c0_i32_1 = arith.constant 0 : i32
    %c0_i32_2 = arith.constant 0 : i32
    return %arg0, %c0_i32, %c0_i32_0, %c0_i32_1 : i32, i32, i32, i32
  }
  func.func @transform_1(%arg0: i32) -> (i32, i32, i32) {
    %c0_i32 = arith.constant 0 : i32
    %c0_i32_0 = arith.constant 0 : i32
    %c0_i32_1 = arith.constant 0 : i32
    return %arg0, %c0_i32, %c0_i32_0 : i32, i32, i32
  }
  func.func @transform_2(%arg0: i32) -> (i32, i32) {
    %c0_i32 = arith.constant 0 : i32
    %c0_i32_0 = arith.constant 0 : i32
    %c0_i32_1 = arith.constant 0 : i32
    return %c0_i32, %c0_i32_0 : i32, i32
  }
  func.func @transform_3(%arg0: i32) -> (i32, i32) {
    %c0_i32 = arith.constant 0 : i32
    %c0_i32_0 = arith.constant 0 : i32
    %c0_i32_1 = arith.constant 0 : i32
    return %c0_i32, %c0_i32_0 : i32, i32
  }
  func.func @transform_4(%arg0: i32) -> (i32, i32) {
    %c0_i32 = arith.constant 0 : i32
    %c0_i32_0 = arith.constant 0 : i32
    %c0_i32_1 = arith.constant 0 : i32
    return %c0_i32, %c0_i32_0 : i32, i32
  }
  func.func @transform_5(%arg0: i32) -> (i32, i32) {
    %c0_i32 = arith.constant 0 : i32
    %c0_i32_0 = arith.constant 0 : i32
    %c0_i32_1 = arith.constant 0 : i32
    return %c0_i32, %c0_i32_0 : i32, i32
  }
  func.func @transform_6(%arg0: i32) -> (i32, i32) {
    %c0_i32 = arith.constant 0 : i32
    %c0_i32_0 = arith.constant 0 : i32
    %c0_i32_1 = arith.constant 0 : i32
    return %c0_i32, %c0_i32_0 : i32, i32
  }
  func.func @transform_7(%arg0: i32) -> (i32, i32) {
    %c0_i32 = arith.constant 0 : i32
    %c0_i32_0 = arith.constant 0 : i32
    %c0_i32_1 = arith.constant 0 : i32
    return %c0_i32, %c0_i32_0 : i32, i32
  }
  func.func @transform_8(%arg0: i32) -> (i32, i32) {
    %c0_i32 = arith.constant 0 : i32
    %c0_i32_0 = arith.constant 0 : i32
    %c0_i32_1 = arith.constant 0 : i32
    return %c0_i32, %c0_i32_0 : i32, i32
  }
  func.func @transform_9(%arg0: i32) -> (i32, i32) {
    %c0_i32 = arith.constant 0 : i32
    %c0_i32_0 = arith.constant 0 : i32
    %c0_i32_1 = arith.constant 0 : i32
    return %c0_i32, %c0_i32_0 : i32, i32
  }
  func.func @transform_10(%arg0: i32) -> (i32, i32, i32, i32) {
    %c0_i32 = arith.constant 0 : i32
    %c0_i32_0 = arith.constant 0 : i32
    %c0_i32_1 = arith.constant 0 : i32
    %c0_i32_2 = arith.constant 0 : i32
    return %arg0, %c0_i32, %c0_i32_0, %c0_i32_1 : i32, i32, i32, i32
  }
}

</mosaic_0001>

<bundles_post_ra>
// kernel: tpu_custom_call.1
= control target key start
LH: loop header
LB: loop body
LE: loop exit
PB: predicated region body
PF: predicated region fallthrough
CT: control target
= control target key end

     0   :  { %s4248_s0 = inlined_call_operand.vmem [shape: f32[2,4,98,16], index: 0, kind: input, shape index: {}]   ;;  %s4249_s1 = inlined_call_operand.vmem [shape: f32[2,1,16], index: 1, kind: input, shape index: {}]   ;;  %s4250_s2 = inlined_call_operand.vmem [shape: f32[16,16], index: 2, kind: input, shape index: {}]   ;;  %s4251_s3 = inlined_call_operand.vmem [shape: f32[96,32], index: 3, kind: input, shape index: {}]   ;;  %s4252_s4 = inlined_call_operand.vmem [shape: f32[32,1], index: 4, kind: input, shape index: {}]   ;;  %s4253_s5 = inlined_call_operand.vmem [shape: f32[96,1], index: 5, kind: input, shape index: {}]   ;;  %s4254_s6 = inlined_call_operand.vmem [shape: f32[96,1], index: 6, kind: input, shape index: {}]   ;;  %s4255_s7 = inlined_call_operand.vmem [shape: f32[2,1], index: 7, kind: input, shape index: {}]   ;;  %s4256_s8 = inlined_call_operand.vmem [shape: f32[1,32], index: 8, kind: input, shape index: {}]   ;;  %s4257_s9 = inlined_call_operand.<no memory space> [shape: f32[1,1], index: 9, kind: input, shape index: {}]   ;;  %s4258_s10 = inlined_call_operand.hbm [shape: f32[2,4,1,16], index: 10, kind: output, shape index: {}]  }
   0x1   :  { %v15_v0 = vstv %s4257_s9 }
   0x2   :  { %16 = vst [vmem:[#allocation2] sm:$0x1] %v15_v0 }
   0x3   :  { %17 = vsyncpa [#allocation4], 0 }
   0x4   :  { %19 = vsyncpa [#allocation4 + $0x1], 0  ;;  %s3289_s15 = smov 0   ;;  %s3291_s16 = smov 0  }
   0x5   :  { %s3293_s17 = smov 0   ;;  %s3295_s18 = smov 0  }
   0x6 LB: > { %s3310_s9 = sadd.s32 4294967295, %s3222_s18   ;;  %s2453_s19 = sadd.s32 4294967294, %s3222_s18   ;;  %s3222_s18 = sphi %s3295_s18, %s4431_s18   ;;  %s3218_s17 = sphi %s3293_s17, %s4430_s17   ;;  %s3214_s16 = sphi %s3291_s16, %s4429_s16   ;;  %s3210_s15 = sphi %s3289_s15, %s4428_s15  }
   0x7   : > { %s3314_s20 = sadd.s32 1, %s3222_s18   ;;  %s252_s21 = sadd.s32 1, %s3218_s17 }
   0x8   : > { %s249_s22 = ssub.s32 %s3222_s18, %s3314_s20  ;;  %p262_p0 = scmp.ne.s32.totalorder %s3218_s17, %s3214_s16 }
   0x9   : > { %p250_p1 = scmp.eq.s32.totalorder %s249_s22, 0  ;;  %p263_p2 = scmp.eq.s32.totalorder %s3310_s9, 1 }
   0xa   : > { %p268_p3 = scmp.ne.s32.totalorder %s3214_s16, %s3210_s15  ;;  %p269_p4 = scmp.eq.s32.totalorder %s2453_s19, 1 }
   0xb   : > { %s3325_s23 = scalar_select %p250_p1, %s3218_s17, %s252_s21  }
   0xc   : > { %p3327_p5 = por %p263_p2, %p262_p0  ;;  %p3331_p6 = por %p269_p4, %p268_p3 }
   0xd   : > { %p2456_p7 = scmp.ge.s32.totalorder %s3222_s18, 1  ;;  %p325_p8 = scmp.lt.s32.totalorder %s3222_s18, 3 }
   0xf   : > { %p326_p9 = pnand %p2456_p7, %p325_p8 }
  0x11   : > { %329 = sbr.rel (%p326_p9) target bundleno = 2268 (0x8dc), region = 60 }
  0x18   : > { %v416_v1 = vld [vmem:[%s4255_s7] sm:$0x3]  ;;  %vm700_vm0 = vcmask 261120   ;;  %v4259_v3 = vmov 0.0   ;;  %v3225_v4 = vmov 0   ;;  %v3349_v5 = vld [vmem:[%s4251_s3 + $0x8] sm:$0xff] }
  0x19   : > { %v3343_v2 = vld [vmem:[%s4251_s3] sm:$0xff]  ;;  %2700 = vmatprep.subr.mxu1 %v4259_v3  ;;  %2969 = vset.pattern.permute.xlu0 %v3225_v4  ;;  %v3355_v6 = vld [vmem:[%s4251_s3 + $0x10] sm:$0xff]  ;;  %v3369_v8 = vld [vmem:[%s4251_s3 + $0x18] sm:$0xff]  ;;  %v4261_v9 = vmov 0.0|0.0   ;;  %vm3227_vm1 = vmmov 0   ;;  %p366_p10 = scmp.lt.s32.totalorder %s3310_s9, 1 }
  0x1a   : > { %2701 = vmatpush3.msra.mxu1 %v4259_v3  ;;  %435 = vperm.xlu0 %2969, %v416_v1   ;;  %v392_v7 = vld [vmem:[%s4253_s5] sm:$0xff]  ;;  %v405_v11 = vld [vmem:[%s4254_s6 + $0x8] sm:$0xff]  ;;  %v3395_v13 = vld [vmem:[%s4251_s3 + $0x30] sm:$0xff]  ;;  %vm448_vm2 = vcmask 130048   ;;  %s363_s26 = sand.u32 1, %s3214_s16   ;;  %vm1052_vm3 = vcmask 122880  }
  0x1b   : > { %2702 = vmatprep.mubr.msk.f32.mxu1 %vm700_vm0, %v3343_v2  ;;  %2970 = vset.pattern.permute.xlu1 %v3225_v4  ;;  %v3375_v10 = vld [vmem:[%s4251_s3 + $0x20] sm:$0xff]  ;;  %v3390_v12 = vld [vmem:[%s4251_s3 + $0x28] sm:$0xff]  ;;  %v395_v16 = vld [vmem:[%s4253_s5 + $0x18] sm:$0xff]  ;;  %s367_s28 = scalar_select %p366_p10, %s3310_s9, 1 }
  0x1c   : > { %2703 = vmatmul.mubr.msk.f32.vlgmr.msra.gmra.mrb[0].mxu1 %vm700_vm0, %v3349_v5  ;;  %2863 = vmatprep.subr.bf16.mxu0 %v4261_v9  ;;  %v374_v14 = vld [vmem:[%s4250_s2] sm:$0xff]  ;;  %v375_v15 = vld [vmem:[%s4250_s2 + $0x8] sm:$0xff]  ;;  %v3415_v18 = vld [vmem:[%s4251_s3 + $0x38] sm:$0xff]  ;;  %s2457_s27 = sshll.u32 %s363_s26, 2  ;;  %s3228_s13 = smov [#allocation3]  }
  0x1d   : > { %2705 = vmatprep.mubr.msk.f32.mxu1 %vm700_vm0, %v3355_v6  ;;  %2866 = vmatprep.subr.bf16.mxu1 %v4261_v9  ;;  %v3406_v17 = vpack.c.bf16 %v375_v15, %v374_v14  ;;  %v3421_v19 = vld [vmem:[%s4251_s3 + $0x40] sm:$0xff]  ;;  %v407_v20 = vld [vmem:[%s4254_s6 + $0x18] sm:$0xff]  ;;  %v3434_v21 = vld [vmem:[%s4251_s3 + $0x48] sm:$0xff]  ;;  %s2923_s29 = smul.u32 416, %s367_s28  ;;  %s373_s12 = scalar_lea.vmem %s4249_s1, %s367_s28 }
  0x1e   : > { %530 = vperm.xlu0 %2969, %v392_v7   ;;  %2697 = vmatprep.mubr.msk.f32.mxu0 %vm3227_vm1, %v4259_v3  ;;  %v3439_v22 = vld [vmem:[%s4251_s3 + $0x50] sm:$0xff]  ;;  %v397_v23 = vld [vmem:[%s4253_s5 + $0x28] sm:$0xff]  ;;  %v3451_v24 = vld [vmem:[%s4251_s3 + $0x58] sm:$0xff]  ;;  %s3738_s28 = scalar_lea.vmem [#allocation3], %s2457_s27  ;;  %s2599_s27 = sshll.u32 %s3310_s9, 6 }
  0x1f   : > { %4324 = vst [vmem:[#allocation6_spill] sm:$0xff] %v3406_v17  ;;  %2865 = vmatpush3.bf16.msra.mxu0 %v3406_v17  ;;  %v409_v25 = vld [vmem:[%s4254_s6 + $0x28] sm:$0xff]  ;;  %v399_v26 = vld [vmem:[%s4253_s5 + $0x38] sm:$0xff]  ;;  %v404_v34 = vld [vmem:[%s4254_s6] sm:$0xff]  ;;  %s3534_s19 = scalar_lea.vmem %s4248_s0, %s2923_s29  ;;  %s2382_s22 = sshll.u32 %s3738_s28, 4  ;;  %s4195_s22 = int_to_ptr.vmem [resolvable:$true] %s2382_s22 }
  0x20   : > { %2706 = vmatmul.mubr.msk.f32.gmra.mrb[2].mxu1 %vm700_vm0, %v3369_v8  ;;  %2872 = vmatprep.subr.bf16.mxu0 %v4261_v9  ;;  %v411_v27 = vld [vmem:[%s4254_s6 + $0x38] sm:$0xff]  ;;  %v401_v28 = vld [vmem:[%s4253_s5 + $0x48] sm:$0xff]  ;;  %v394_v35 = vld [vmem:[%s4253_s5 + $0x10] sm:$0xff]  ;;  %s4201_s11 = scalar_lea.hbm %s4258_s10, %s2599_s27  ;;  %s3160_s9 = scalar_lea.vmem %s4195_s22, 64 }
  0x21   : > { %2708 = vmatprep.mubr.msk.f32.mxu1 %vm700_vm0, %v3375_v10  ;;  %v413_v29 = vld [vmem:[%s4254_s6 + $0x48] sm:$0xff]  ;;  %v403_v32 = vld [vmem:[%s4253_s5 + $0x58] sm:$0xff]  ;;  %v406_v37 = vld [vmem:[%s4254_s6 + $0x10] sm:$0xff]  ;;  %p3161_p11 = scmp.ne.s32.totalorder %s4195_s22, %s3160_s9  ;;  %s3164_s14 = sshll.u32 %s3228_s13, 4  ;;  %s3165_s14 = int_to_ptr.vmem [resolvable:$false] %s3164_s14 }
  0x22   : > { %619 = vperm.xlu0 %2969, %v405_v11   ;;  %v389_v30 = vld [vmem:[%s4252_s4 + $0x8] sm:$0xff]  ;;  %v415_v33 = vld [vmem:[%s4254_s6 + $0x58] sm:$0xff]  ;;  %v396_v38 = vld [vmem:[%s4253_s5 + $0x20] sm:$0xff]  ;;  %p3167_p0 = scmp.lt.s32.totalorder %s4195_s22, %s3165_s14 }
  0x23   : > { %v393_v31 = vld [vmem:[%s4253_s5 + $0x8] sm:$0xff]  ;;  %v391_v36 = vld [vmem:[%s4252_s4 + $0x18] sm:$0xff]  ;;  %v408_v39 = vld [vmem:[%s4254_s6 + $0x20] sm:$0xff]  ;;  %p3162_p12 = pnand %p3161_p11, %p3327_p5 }
  0x24   : > { %2709 = vmatmul.mubr.msk.f32.gmra.mrb[4].mxu1 %vm700_vm0, %v3390_v12  ;;  %535 = vperm.xlu1 %2970, %v393_v31   ;;  %v398_v40 = vld [vmem:[%s4253_s5 + $0x30] sm:$0xff]  ;;  %v400_v42 = vld [vmem:[%s4253_s5 + $0x40] sm:$0xff] }
  0x25   : > { %2711 = vmatprep.mubr.msk.f32.mxu1 %vm700_vm0, %v3395_v13  ;;  %v410_v41 = vld [vmem:[%s4254_s6 + $0x30] sm:$0xff]  ;;  %v412_v43 = vld [vmem:[%s4254_s6 + $0x40] sm:$0xff]  ;;  %p3163_p13 = pneg %p3162_p12 }
  0x26   : > { %545 = vperm.xlu0 %2969, %v395_v16   ;;  %v388_v44 = vld [vmem:[%s4252_s4] sm:$0xff]  ;;  %v402_v45 = vld [vmem:[%s4253_s5 + $0x50] sm:$0xff] }
  0x27   : > { %v414_v46 = vld [vmem:[%s4254_s6 + $0x50] sm:$0xff]  ;;  %v418_v48 = vld [vmem:[#allocation2] sm:$0x1] }
  0x28   : > { %2712 = vmatmul.mubr.msk.f32.gmra.mrb[6].mxu1 %vm700_vm0, %v3415_v18  ;;  %614 = vperm.xlu1 %2970, %v404_v34   ;;  %v390_v47 = vld [vmem:[%s4252_s4 + $0x10] sm:$0xff]  ;;  %v3536_v49 = vld [vmem:[%s373_s12] ss:$0 sm:$0xff]  ;;  %s4207_s12 = scalar_lea.sflag [#allocation4], %s363_s26 }
  0x29   : > { %2714 = vmatprep.mubr.msk.f32.mxu1 %vm700_vm0, %v3421_v19  ;;  %v432_v51 = vld [vmem:[%s3534_s19 + $0x60] sm:$0x3]  ;;  %v426_v9 = vld [vmem:[%s3534_s19 + $0x30] sm:$0xff] }
  0x2a   : > { %629 = vperm.xlu0 %2969, %v407_v20  }
  0x2c   : > { %2715 = vmatmul.mubr.msk.f32.gmra.mrb[8].mxu1 %vm700_vm0, %v3434_v21  ;;  %540 = vperm.xlu1 %2970, %v394_v35  }
  0x2d   : > { %2717 = vmatprep.mubr.msk.f32.mxu1 %vm700_vm0, %v3439_v22 }
  0x2e   : > { %555 = vperm.xlu0 %2969, %v397_v23  }
  0x30   : > { %2718 = vmatmul.mubr.msk.f32.gmra.mrb[10].mxu1 %vm700_vm0, %v3451_v24  ;;  %624 = vperm.xlu1 %2970, %v406_v37   ;;  %v672_v37 = vlaneseq }
  0x31   : > { %2728 = vmatprep.mubr.msk.f32.mxu1 %vm3227_vm1, %v4259_v3 }
  0x32   : > { %639 = vperm.xlu0 %2969, %v409_v25  }
  0x34   : > { %550 = vperm.xlu1 %2970, %v396_v38  }
  0x36   : > { %565 = vperm.xlu0 %2969, %v399_v26  }
  0x38   : > { %634 = vperm.xlu1 %2970, %v408_v39   ;;  %v673_v39 = vshrl.u32 %v672_v37, 7 }
  0x3a   : > { %649 = vperm.xlu0 %2969, %v411_v27  }
  0x3c   : > { %560 = vperm.xlu1 %2970, %v398_v40  }
  0x3e   : > { %575 = vperm.xlu0 %2969, %v401_v28  }
  0x40   : > { %644 = vperm.xlu1 %2970, %v410_v41  }
  0x42   : > { %659 = vperm.xlu0 %2969, %v413_v29  }
  0x44   : > { %570 = vperm.xlu1 %2970, %v400_v42  }
  0x46   : > { %925 = vperm.xlu0 %2969, %v389_v30  }
  0x48   : > { %654 = vperm.xlu1 %2970, %v412_v43   ;;  %v420_v43 = vld [vmem:[%s3534_s19] sm:$0xff] }
  0x4a   : > { %585 = vperm.xlu0 %2969, %v403_v32  }
  0x4c   : > { %920 = vperm.xlu1 %2970, %v388_v44   ;;  %v421_v44 = vld [vmem:[%s3534_s19 + $0x8] sm:$0xff] }
  0x4e   : > { %669 = vperm.xlu0 %2969, %v415_v33  }
  0x50   : > { %580 = vperm.xlu1 %2970, %v402_v45  }
  0x52   : > { %935 = vperm.xlu0 %2969, %v391_v36  }
  0x54   : > { %664 = vperm.xlu1 %2970, %v414_v46   ;;  %v3609_v46 = vsub.s32 0, %v673_v39  ;;  %v423_v39 = vld [vmem:[%s3534_s19 + $0x18] sm:$0xff] }
  0x56   : > { %4341 = vst [vmem:[#allocation23_spill] sm:$0xff] %v3609_v46 }
  0x58   : > { %930 = vperm.xlu1 %2970, %v390_v47  }
  0x5c   : > { %972 = vperm.xlu1 %2970, %v418_v48  }
  0x99   : > { %v3538_v50 = vpop.permute.xlu0 %435 }
  0x9a   : > { %4325 = vst [vmem:[#allocation7_spill] sm:$0xff] %v3538_v50  ;;  %v444_v52 = vmul.f32 %v3536_v49, %v3538_v50 }
  0x9c   : > { %v445_v53 = vadd.f32 %v444_v52, %v432_v51  ;;  %v422_v51 = vld [vmem:[%s3534_s19 + $0x10] sm:$0xff] }
  0x9d   : > { %v3573_v11 = vpop.permute.xlu0 %530 }
  0x9e   : > { %v447_v54 = vrot.slane %v445_v53, 1  ;;  %4327 = vst [vmem:[#allocation9_spill] sm:$0xff] %v3573_v11  ;;  %v588_v41 = vmul.f32 %v3536_v49, %v3573_v11 }
  0xa0   : > { %2698 = vmatmul.mubr.msk.f32.vlgmr.msra.gmra.mrb[0].mxu0 %vm448_vm2, %v447_v54 }
  0xa1   : > { %2874 = vmatpush3.bf16.msra.mxu0 %v3406_v17  ;;  %2735 = vmatprep.mubr.msk.f32.mxu0 %vm3227_vm1, %v4259_v3  ;;  %v3577_v15 = vpop.permute.xlu0 %619 }
  0xa2   : > { %4329 = vst [vmem:[#allocation11_spill] sm:$0xff] %v3577_v15 }
  0xa3   : > { %v3571_v7 = vpop.permute.xlu1 %535 }
  0xa4   : > { %4326 = vst [vmem:[#allocation8_spill] sm:$0xff] %v3571_v7  ;;  %v589_v42 = vmul.f32 %v3536_v49, %v3571_v7 }
  0xa5   : > { %v3581_v20 = vpop.permute.xlu0 %545 }
  0xa6   : > { %4331 = vst [vmem:[#allocation13_spill] sm:$0xff] %v3581_v20 }
  0xa7   : > { %v3575_v14 = vpop.permute.xlu1 %614 }
  0xa8   : > { %4328 = vst [vmem:[#allocation10_spill] sm:$0xff] %v3575_v14 }
  0xa9   : > { %v3585_v29 = vpop.permute.xlu0 %629 }
  0xaa   : > { %4333 = vst [vmem:[#allocation15_spill] sm:$0xff] %v3585_v29 }
  0xab   : > { %v3579_v16 = vpop.permute.xlu1 %540 }
  0xac   : > { %4330 = vst [vmem:[#allocation12_spill] sm:$0xff] %v3579_v16  ;;  %v590_v45 = vmul.f32 %v3536_v49, %v3579_v16  ;;  %v427_v16 = vld [vmem:[%s3534_s19 + $0x38] sm:$0xff] }
  0xad   : > { %v3589_v31 = vpop.permute.xlu0 %555 }
  0xae   : > { %4335 = vst [vmem:[#allocation17_spill] sm:$0xff] %v3589_v31  ;;  %v593_v48 = vmul.f32 %v3536_v49, %v3589_v31  ;;  %v602_v3 = vadd.f32 %v590_v45, %v422_v51 }
  0xaf   : > { %v3583_v23 = vpop.permute.xlu1 %624 }
  0xb0   : > { %4332 = vst [vmem:[#allocation14_spill] sm:$0xff] %v3583_v23 }
  0xb1   : > { %v3593_v35 = vpop.permute.xlu0 %639 }
  0xb2   : > { %4337 = vst [vmem:[#allocation19_spill] sm:$0xff] %v3593_v35 }
  0xb3   : > { %v3587_v30 = vpop.permute.xlu1 %550 }
  0xb4   : > { %4334 = vst [vmem:[#allocation16_spill] sm:$0xff] %v3587_v30  ;;  %v592_v52 = vmul.f32 %v3536_v49, %v3587_v30 }
  0xb5   : > { %v3597_v38 = vpop.permute.xlu0 %565 }
  0xb6   : > { %4339 = vst [vmem:[#allocation21_spill] sm:$0xff] %v3597_v38  ;;  %v595_v45 = vmul.f32 %v3536_v49, %v3597_v38 }
  0xb7   : > { %v3591_v32 = vpop.permute.xlu1 %634 }
  0xb8   : > { %4336 = vst [vmem:[#allocation18_spill] sm:$0xff] %v3591_v32 }
  0xb9   : > { %v3617_v54 = vpop.permute.xlu0 %649 }
  0xba   : > { %4342 = vst [vmem:[#allocation24_spill] sm:$0xff] %v3617_v54 }
  0xbb   : > { %v3595_v36 = vpop.permute.xlu1 %560 }
  0xbc   : > { %4338 = vst [vmem:[#allocation20_spill] sm:$0xff] %v3595_v36 }
  0xbf   : > { %v3599_v40 = vpop.permute.xlu1 %644 }
  0xc0   : > { %4340 = vst [vmem:[#allocation22_spill] sm:$0xff] %v3599_v40 }
  0xc3   : > { %v3627_v37 = vpop.permute.xlu1 %570 }
  0xc4   : > { %4343 = vst [vmem:[#allocation25_spill] sm:$0xff] %v3627_v37 }
  0xef   : > { %v3547_v55 = vpop.f32.mrb[0].mxu1 }
  0xf0   : > { %v3549_v56 = vpop.f32.mrb[1].mxu1 }
  0xf3   : > { %v3551_v57 = vpop.f32.mrb[2].mxu1 }
  0xf4   : > { %v3553_v58 = vpop.f32.mrb[3].mxu1 }
  0xf7   : > { %v3555_v59 = vpop.f32.mrb[4].mxu1 }
  0xf8   : > { %v3557_v60 = vpop.f32.mrb[5].mxu1 }
  0xfb   : > { %v3559_v61 = vpop.f32.mrb[6].mxu1 }
  0xfc   : > { %v3561_v62 = vpop.f32.mrb[7].mxu1 }
  0xff   : > { %v3563_v63 = vpop.f32.mrb[8].mxu1 }
 0x100   : > { %v3565_v0 = vpop.f32.mrb[9].mxu1 }
 0x103   : > { %v3567_v1 = vpop.f32.mrb[10].mxu1 }
 0x104   : > { %v3569_v4 = vpop.f32.mrb[11].mxu1 }
 0x173   : > { %v517_v25 = vpop.f32.mrb[0].mxu0 }
 0x174   : > { %v521_v26 = vadd.f32 %v517_v25, %v445_v53  ;;  %v2699_v27 = vpop.f32.mrb[1].mxu0  ;;  %v425_v53 = vld [vmem:[%s3534_s19 + $0x28] sm:$0xff]  ;;  %v424_v25 = vld [vmem:[%s3534_s19 + $0x20] sm:$0xff] }
 0x175   : > { %v600_v27 = vadd.f32 %v588_v41, %v420_v43  ;;  %v605_v43 = vadd.f32 %v593_v48, %v425_v53 }
 0x176   : > { %v2461_v28 = vmul.f32 -1.442695, %v521_v26 }
 0x178   : > { %2971 = vpow2.f32 %v2461_v28  ;;  %v591_v28 = vmul.f32 %v3536_v49, %v3581_v20 }
 0x17a   : > { %v603_v31 = vadd.f32 %v591_v28, %v423_v39 }
 0x182   : > { %v2972_v33 = vpop.eup %2971 }
 0x183   : > { %v525_v34 = vadd.f32 1.0, %v2972_v33  ;;  %v601_v33 = vadd.f32 %v589_v42, %v421_v44  ;;  %v604_v42 = vadd.f32 %v592_v52, %v424_v25 }
 0x185   : > { %2973 = vrcp.f32 %v525_v34  ;;  %v594_v34 = vmul.f32 %v3536_v49, %v3595_v36 }
 0x18f   : > { %v2974_v47 = vpop.eup %2973 }
 0x190   : > { %v3621_v26 = vrot.slane %v2974_v47, %v3609_v46 }
 0x192   : > { %v678_v17 = vmul.f32 %v3621_v26, %v3583_v23  ;;  %v676_v47 = vmul.f32 %v3621_v26, %v3575_v14  ;;  %v677_v41 = vmul.f32 %v3621_v26, %v3577_v15  ;;  %v680_v44 = vmul.f32 %v3621_v26, %v3591_v32  ;;  %v3644_v15 = vpop.permute.xlu0 %575  ;;  %v3651_v32 = vpop.permute.xlu1 %654 }
 0x193   : > { %v681_v36 = vmul.f32 %v3621_v26, %v3593_v35  ;;  %v606_v14 = vadd.f32 %v594_v34, %v426_v9  ;;  %4344 = vst [vmem:[#allocation26_spill] sm:$0xff] %v3644_v15  ;;  %v679_v25 = vmul.f32 %v3621_v26, %v3585_v29  ;;  %v682_v9 = vmul.f32 %v3621_v26, %v3599_v40 }
 0x194   : > { %v690_v51 = vadd.f32 %v678_v17, %v602_v3  ;;  %v688_v30 = vadd.f32 %v676_v47, %v600_v27  ;;  %v689_v23 = vadd.f32 %v677_v41, %v601_v33  ;;  %v692_v20 = vadd.f32 %v680_v44, %v604_v42 }
 0x195   : > { %v693_v11 = vadd.f32 %v681_v36, %v605_v43  ;;  %v683_v36 = vmul.f32 %v3621_v26, %v3617_v54 }
 0x196   : > { %v864_v48 = vadd.f32 %v3553_v58, %v690_v51  ;;  %v862_v52 = vadd.f32 %v3549_v56, %v688_v30  ;;  %v863_v53 = vadd.f32 %v3547_v55, %v689_v23  ;;  %v890_v3 = vadd.f32 %v3557_v60, %v692_v20  ;;  %v3664_v20 = vpop.permute.xlu1 %920 }
 0x197   : > { %v891_v17 = vadd.f32 %v3555_v59, %v693_v11  ;;  %v607_v58 = vadd.f32 %v595_v45, %v427_v16  ;;  %v691_v55 = vadd.f32 %v679_v25, %v603_v31  ;;  %v694_v23 = vadd.f32 %v682_v9, %v606_v14  ;;  %v3661_v59 = vpop.permute.xlu0 %659 }
 0x198   : > { %v2476_v27 = vmul.f32 -1.442695, %v864_v48  ;;  %v2474_v56 = vmul.f32 -1.442695, %v862_v52  ;;  %v2475_v30 = vmul.f32 -1.442695, %v863_v53  ;;  %v597_v25 = vmul.f32 %v3536_v49, %v3644_v15 }
 0x199   : > { %v695_v28 = vadd.f32 %v683_v36, %v607_v58  ;;  %v865_v33 = vadd.f32 %v3551_v57, %v691_v55  ;;  %v892_v60 = vadd.f32 %v3561_v62, %v694_v23  ;;  %v2478_v39 = vmul.f32 -1.442695, %v890_v3  ;;  %v428_v55 = vld [vmem:[%s3534_s19 + $0x40] sm:$0xff] }
 0x19a   : > { %2975 = vpow2.f32 %v2476_v27  ;;  %v2479_v47 = vmul.f32 -1.442695, %v891_v17  ;;  %v3668_v57 = vpop.permute.xlu1 %580  ;;  %v429_v17 = vld [vmem:[%s3534_s19 + $0x48] sm:$0xff]  ;;  %v596_v58 = vmul.f32 %v3536_v49, %v3627_v37  ;;  %v430_v27 = vld [vmem:[%s3534_s19 + $0x50] sm:$0xff] }
 0x19b   : > { %2977 = vpow2.f32 %v2474_v56  ;;  %v893_v11 = vadd.f32 %v3559_v61, %v695_v28  ;;  %v2477_v16 = vmul.f32 -1.442695, %v865_v33  ;;  %v2480_v34 = vmul.f32 -1.442695, %v892_v60  ;;  %v3666_v31 = vpop.permute.xlu0 %925  ;;  %4345 = vst [vmem:[#allocation27_spill] sm:$0xff] %v3668_v57 }
 0x19c   : > { %2979 = vpow2.f32 %v2475_v30  ;;  %v598_v9 = vmul.f32 %v3536_v49, %v3668_v57  ;;  %v609_v33 = vadd.f32 %v597_v25, %v429_v17 }
 0x19d   : > { %2981 = vpow2.f32 %v2477_v16  ;;  %v2481_v14 = vmul.f32 -1.442695, %v893_v11  ;;  %v684_v11 = vmul.f32 %v3621_v26, %v3651_v32 }
 0x19e   : > { %2983 = vpow2.f32 %v2480_v34  ;;  %v3672_v48 = vpop.permute.xlu1 %664  ;;  %v610_v34 = vadd.f32 %v598_v9, %v430_v27 }
 0x19f   : > { %2985 = vpow2.f32 %v2478_v39  ;;  %v3670_v45 = vpop.permute.xlu0 %585  ;;  %v686_v23 = vmul.f32 %v3621_v26, %v3672_v48 }
 0x1a0   : > { %2987 = vpow2.f32 %v2479_v47  ;;  %4346 = vst [vmem:[#allocation28_spill] sm:$0xff] %v3670_v45  ;;  %v685_v47 = vmul.f32 %v3621_v26, %v3661_v59 }
 0x1a1   : > { %2989 = vpow2.f32 %v2481_v14 }
 0x1a2   : > { %v3687_v60 = vpop.permute.xlu1 %930 }
 0x1a3   : > { %v3682_v30 = vpop.permute.xlu0 %669  ;;  %v940_v39 = vadd.f32 %v3687_v60, %v3569_v4 }
 0x1a4   : > { %v2976_v62 = vpop.eup %2975 }
 0x1a5   : > { %v2978_v41 = vpop.eup %2977  ;;  %v880_v61 = vadd.f32 1.0, %v2976_v62 }
 0x1a6   : > { %v2980_v43 = vpop.eup %2979  ;;  %v878_v42 = vadd.f32 1.0, %v2978_v41  ;;  %v599_v41 = vmul.f32 %v3536_v49, %v3670_v45  ;;  %v687_v49 = vmul.f32 %v3621_v26, %v3682_v30 }
 0x1a7   : > { %2991 = vrcp.f32 %v880_v61  ;;  %v879_v44 = vadd.f32 1.0, %v2980_v43  ;;  %v2982_v51 = vpop.eup %2981  ;;  %v608_v61 = vadd.f32 %v596_v58, %v428_v55  ;;  %v938_v43 = vadd.f32 %v3664_v20, %v3565_v0  ;;  %v3704_v9 = vpop.permute.xlu0 %935 }
 0x1a8   : > { %2993 = vrcp.f32 %v878_v42  ;;  %v881_v52 = vadd.f32 1.0, %v2982_v51  ;;  %v2984_v53 = vpop.eup %2983  ;;  %v431_v51 = vld [vmem:[%s3534_s19 + $0x58] sm:$0xff]  ;;  %v697_v0 = vadd.f32 %v685_v47, %v609_v33 }
 0x1a9   : > { %2995 = vrcp.f32 %v879_v44  ;;  %v2986_v3 = vpop.eup %2985  ;;  %v908_v28 = vadd.f32 1.0, %v2984_v53  ;;  %v698_v53 = vadd.f32 %v686_v23, %v610_v34  ;;  %v611_v27 = vadd.f32 %v599_v41, %v431_v51 }
 0x1aa   : > { %2997 = vrcp.f32 %v881_v52  ;;  %v2988_v36 = vpop.eup %2987  ;;  %v906_v16 = vadd.f32 1.0, %v2986_v3  ;;  %v939_v52 = vadd.f32 %v3563_v63, %v3666_v31  ;;  %v696_v3 = vadd.f32 %v684_v11, %v608_v61 }
 0x1ab   : > { %v2990_v56 = vpop.eup %2989  ;;  %v907_v14 = vadd.f32 1.0, %v2988_v36  ;;  %2999 = vrcp.f32 %v908_v28  ;;  %v941_v63 = vadd.f32 %v3567_v1, %v3704_v9  ;;  %v699_v28 = vadd.f32 %v687_v49, %v611_v27 }
 0x1ac   : > { %v909_v42 = vadd.f32 1.0, %v2990_v56  ;;  %3001 = vrcp.f32 %v906_v16 }
 0x1ad   : > { %3003 = vrcp.f32 %v907_v14 }
 0x1ae   : > { %3005 = vrcp.f32 %v909_v42 }
 0x1b1   : > { %v2992_v62 = vpop.eup %2991 }
 0x1b2   : > { %v2994_v44 = vpop.eup %2993  ;;  %v944_v4 = vmul.f32 %v2992_v62, %v940_v39 }
 0x1b3   : > { %v2996_v25 = vpop.eup %2995  ;;  %v942_v17 = vmul.f32 %v2994_v44, %v938_v43 }
 0x1b4   : > { %v948_v36 = vadd.f32 %v944_v4, %v698_v53  ;;  %v943_v58 = vmul.f32 %v2996_v25, %v939_v52  ;;  %v2998_v55 = vpop.eup %2997 }
 0x1b5   : > { %v946_v56 = vadd.f32 %v942_v17, %v696_v3  ;;  %v945_v11 = vmul.f32 %v2998_v55, %v941_v63  ;;  %v3000_v16 = vpop.eup %2999  ;;  %v4347_v63 = vmov 0.0|0.0   ;;  %v3724_v55 = vld [vmem:[%s4256_s8] sm:$0x1] }
 0x1b6   : > { %3007 = vtanh.f32 %v948_v36  ;;  %v947_v23 = vadd.f32 %v943_v58, %v697_v0  ;;  %v3002_v34 = vpop.eup %3001  ;;  %v956_v47 = vsub.f32 1.0, %v3000_v16  ;;  %v964_v43 = vmul.f32 0.0, %v3000_v16 }
 0x1b7   : > { %3009 = vtanh.f32 %v946_v56  ;;  %v949_v26 = vadd.f32 %v945_v11, %v699_v28  ;;  %v3004_v33 = vpop.eup %3003  ;;  %v954_v62 = vsub.f32 1.0, %v3002_v34  ;;  %v962_v51 = vmul.f32 0.0, %v3002_v34  ;;  %v973_v28 = vpop.permute.xlu1 %972 }
 0x1b8   : > { %3011 = vtanh.f32 %v947_v23  ;;  %v3006_v39 = vpop.eup %3005  ;;  %v955_v1 = vsub.f32 1.0, %v3004_v33  ;;  %v963_v53 = vmul.f32 0.0, %v3004_v33  ;;  %v4348_v23 = vmov 0.0  }
 0x1b9   : > { %3013 = vtanh.f32 %v949_v26  ;;  %v957_v3 = vsub.f32 1.0, %v3006_v39  ;;  %v965_v0 = vmul.f32 0.0, %v3006_v39  ;;  %v3735_v11 = vrot.slane %v973_v28, %v3609_v46  ;;  %v2495_v39 = vld [vmem:[%s3534_s19 + $0xc8] sm:$0x3]  ;;  %v2485_v28 = vld [vmem:[%s3534_s19 + $0x78] sm:$0xff] }
 0x1bb   : > { %4349 = vst [vmem:[#allocation29_spill] sm:$0xff] %v3735_v11 }
 0x1c0   : > { %v3008_v14 = vpop.eup %3007 }
 0x1c1   : > { %v3010_v41 = vpop.eup %3009  ;;  %v960_v61 = vmul.f32 %v3008_v14, %v956_v47 }
 0x1c2   : > { %v3012_v42 = vpop.eup %3011  ;;  %v958_v44 = vmul.f32 %v3010_v41, %v954_v62 }
 0x1c3   : > { %v959_v52 = vmul.f32 %v3012_v42, %v955_v1  ;;  %v3708_v4 = vadd.f32 %v964_v43, %v960_v61  ;;  %v3014_v17 = vpop.eup %3013  ;;  %v2484_v43 = vld [vmem:[%s3534_s19 + $0x70] sm:$0xff]  ;;  %v2483_v42 = vld [vmem:[%s3534_s19 + $0x68] sm:$0xff] }
 0x1c4   : > { %v3710_v25 = vadd.f32 %v962_v51, %v958_v44  ;;  %v961_v36 = vmul.f32 %v3014_v17, %v957_v3  ;;  %v4350_v44 = vld [vmem:[#allocation9_spill] sm:$0xff]  ;;  %v4352_v3 = vld [vmem:[#allocation12_spill] sm:$0xff] }
 0x1c5   : > { %v3712_v49 = vadd.f32 %v963_v53, %v959_v52  ;;  %v4351_v52 = vld [vmem:[#allocation13_spill] sm:$0xff] }
 0x1c6   : > { %v3716_v27 = vadd.f32 %v965_v0, %v961_v36  ;;  %v4353_v36 = vld [vmem:[#allocation17_spill] sm:$0xff] }
 0x1c7   : > { %v2867_v58 = vpack.c.bf16 %v3712_v49, %v3710_v25 }
 0x1c8   : > { %v2870_v56 = vpack.c.bf16 %v3716_v27, %v3708_v4 }
 0x1c9   : > { %2868 = vmatpush3.bf16.msra.mxu1 %v2867_v58  ;;  %2876 = vmatprep.subr.bf16.mxu0 %v2867_v58 }
 0x1ca   : > { %2869 = vmatprep.subr.bf16.mxu1 %v4347_v63 }
 0x1cd   : > { %2871 = vmatpush3.bf16.msra.mxu1 %v2870_v56 }
 0x1ce   : > { %2883 = vmatprep.subr.bf16.mxu1 %v4347_v63 }
 0x1d0   : > { %2729 = vmatmul.mubr.msk.f32.vlgmr.msra.gmra.mrb[12].mxu1 %vm700_vm0, %v3724_v55 }
 0x1d1   : > { %2772 = vmatprep.mubr.msk.f32.mxu1 %vm3227_vm1, %v4348_v23 }
 0x2a3   : > { %v1048_v26 = vpop.f32.mrb[12].mxu1 }
 0x2a4   : > { %v1049_v16 = vadd.f32 %v1048_v26, %v3735_v11  ;;  %v2730_v34 = vpop.f32.mrb[13].mxu1  ;;  %v2488_v26 = vld [vmem:[%s3534_s19 + $0x90] sm:$0xff] }
 0x2a6   : > { %1053 = vst.msk [vmem:[%s3738_s28] sm:$0x1] %vm1052_vm3, %v1049_v16  ;;  %v3743_v33 = vrot.slane %v1049_v16, %v3609_v46  ;;  %v4354_v16 = vld [vmem:[#allocation16_spill] sm:$0xff] }
 0x2a8   : > { %v1072_v47 = vmul.f32 %v3743_v33, %v3538_v50  ;;  %v1156_v61 = vmul.f32 %v3743_v33, %v3571_v7  ;;  %v1155_v51 = vmul.f32 %v3743_v33, %v4350_v44  ;;  %v1158_v53 = vmul.f32 %v3743_v33, %v4351_v52 }
 0x2a9   : > { %v1157_v17 = vmul.f32 %v3743_v33, %v4352_v3  ;;  %v1160_v0 = vmul.f32 %v3743_v33, %v4353_v36  ;;  %v1159_v34 = vmul.f32 %v3743_v33, %v4354_v16 }
 0x2aa   : > { %v1073_v14 = vadd.f32 %v2495_v39, %v1072_v47  ;;  %v1162_v39 = vmul.f32 %v3743_v33, %v3597_v38  ;;  %v1167_v3 = vadd.f32 %v2483_v42, %v1155_v51  ;;  %v1165_v42 = vmul.f32 %v3743_v33, %v3668_v57  ;;  %v4356_v51 = vld [vmem:[#allocation11_spill] sm:$0xff]  ;;  %v2491_v57 = vld [vmem:[%s3534_s19 + $0xa8] sm:$0xff] }
 0x2ab   : > { %v1169_v16 = vadd.f32 %v2485_v28, %v1157_v17  ;;  %v1172_v44 = vadd.f32 %v2488_v26, %v1160_v0  ;;  %v4357_v17 = vld [vmem:[#allocation10_spill] sm:$0xff] }
 0x2ac   : > { %v1075_v62 = vrot.slane %v1073_v14, 1 }
 0x2ae   : > { %2736 = vmatmul.mubr.msk.f32.vlgmr.msra.gmra.mrb[2].mxu0 %vm448_vm2, %v1075_v62  ;;  %v2490_v62 = vld [vmem:[%s3534_s19 + $0xa0] sm:$0xff] }
 0x2af   : > { %2878 = vmatpush3.bf16.msra.mxu0 %v2867_v58  ;;  %2746 = vmatprep.mubr.msk.f32.mxu0 %vm700_vm0, %v3343_v2  ;;  %v1174_v11 = vadd.f32 %v2490_v62, %v1162_v39 }
 0x2b0   : > { %2880 = vmatprep.subr.bf16.mxu0 %v2870_v56 }
 0x2b3   : > { %2882 = vmatpush3.bf16.msra.mxu0 %v2870_v56  ;;  %v2486_v56 = vld [vmem:[%s3534_s19 + $0x80] sm:$0xff] }
 0x2b4   : > { %2900 = vmatprep.subr.bf16.mxu0 %v4347_v63  ;;  %v1170_v52 = vadd.f32 %v2486_v56, %v1158_v53  ;;  %v4358_v56 = vld [vmem:[#allocation14_spill] sm:$0xff] }
 0x2b6   : > { %2747 = vmatmul.mubr.msk.f32.vlgmr.msra.gmra.mrb[4].mxu0 %vm700_vm0, %v3349_v5 }
 0x2b7   : > { %2749 = vmatprep.mubr.msk.f32.mxu0 %vm700_vm0, %v3355_v6 }
 0x2ba   : > { %2750 = vmatmul.mubr.msk.f32.gmra.mrb[6].mxu0 %vm700_vm0, %v3369_v8 }
 0x2bb   : > { %2752 = vmatprep.mubr.msk.f32.mxu0 %vm700_vm0, %v3375_v10 }
 0x2be   : > { %2753 = vmatmul.mubr.msk.f32.gmra.mrb[8].mxu0 %vm700_vm0, %v3390_v12 }
 0x2bf   : > { %2755 = vmatprep.mubr.msk.f32.mxu0 %vm700_vm0, %v3395_v13 }
 0x2c2   : > { %2756 = vmatmul.mubr.msk.f32.gmra.mrb[10].mxu0 %vm700_vm0, %v3415_v18 }
 0x2c3   : > { %2758 = vmatprep.mubr.msk.f32.mxu0 %vm700_vm0, %v3421_v19 }
 0x2c6   : > { %2759 = vmatmul.mubr.msk.f32.gmra.mrb[12].mxu0 %vm700_vm0, %v3434_v21 }
 0x2c7   : > { %2761 = vmatprep.mubr.msk.f32.mxu0 %vm700_vm0, %v3439_v22 }
 0x2ca   : > { %2762 = vmatmul.mubr.msk.f32.gmra.mrb[14].mxu0 %vm700_vm0, %v3451_v24 }
 0x2cb   : > { %2816 = vmatprep.mubr.msk.f32.mxu0 %vm3227_vm1, %v4348_v23 }
 0x381   : > { %v1144_v2 = vpop.f32.mrb[2].mxu0 }
 0x382   : > { %v1148_v5 = vadd.f32 %v1144_v2, %v1073_v14  ;;  %v2737_v6 = vpop.f32.mrb[3].mxu0  ;;  %v2487_v14 = vld [vmem:[%s3534_s19 + $0x88] sm:$0xff]  ;;  %v4355_v2 = vld [vmem:[#allocation20_spill] sm:$0xff] }
 0x383   : > { %v1164_v6 = vmul.f32 %v3743_v33, %v3644_v15  ;;  %v1171_v50 = vadd.f32 %v2487_v14, %v1159_v34  ;;  %v4359_v34 = vld [vmem:[#allocation18_spill] sm:$0xff] }
 0x384   : > { %v2497_v8 = vmul.f32 -1.442695, %v1148_v5  ;;  %v1161_v5 = vmul.f32 %v3743_v33, %v4355_v2  ;;  %v1163_v2 = vmul.f32 %v3743_v33, %v3627_v37 }
 0x386   : > { %3015 = vpow2.f32 %v2497_v8  ;;  %v1168_v8 = vadd.f32 %v2484_v43, %v1156_v61  ;;  %v1166_v43 = vmul.f32 %v3743_v33, %v3670_v45 }
 0x389   : > { %v3776_v10 = vpop.f32.mrb[4].mxu0 }
 0x38a   : > { %v3778_v12 = vpop.f32.mrb[5].mxu0 }
 0x38d   : > { %v3780_v13 = vpop.f32.mrb[6].mxu0 }
 0x38e   : > { %v3782_v18 = vpop.f32.mrb[7].mxu0 }
 0x390   : > { %v3016_v19 = vpop.eup %3015 }
 0x391   : > { %v1152_v21 = vadd.f32 1.0, %v3016_v19  ;;  %v2754_v22 = vpop.f32.mrb[8].mxu0  ;;  %v2489_v19 = vld [vmem:[%s3534_s19 + $0x98] sm:$0xff] }
 0x392   : > { %v1293_v24 = vpop.f32.mrb[9].mxu0  ;;  %v1173_v15 = vadd.f32 %v2489_v19, %v1161_v5 }
 0x393   : > { %3017 = vrcp.f32 %v1152_v21  ;;  %v2492_v21 = vld [vmem:[%s3534_s19 + $0xb0] sm:$0xff] }
 0x394   : > { %v1176_v61 = vadd.f32 %v2492_v21, %v1164_v6 }
 0x395   : > { %v2757_v41 = vpop.f32.mrb[10].mxu0 }
 0x396   : > { %v1303_v1 = vpop.f32.mrb[11].mxu0 }
 0x399   : > { %v3796_v58 = vpop.f32.mrb[12].mxu0 }
 0x39a   : > { %v3805_v47 = vpop.f32.mrb[13].mxu0 }
 0x39d   : > { %v3018_v36 = vpop.eup %3017  ;;  %v3815_v7 = vpop.f32.mrb[14].mxu0 }
 0x39e   : > { %v1182_v38 = vrot.slane %v3018_v36, %v3609_v46  ;;  %v3820_v23 = vpop.f32.mrb[15].mxu0 }
 0x3a0   : > { %v1184_v53 = vmul.f32 %v1182_v38, %v4356_v51  ;;  %v1183_v0 = vmul.f32 %v1182_v38, %v4357_v17  ;;  %v1186_v36 = vmul.f32 %v1182_v38, %v3585_v29  ;;  %v1185_v28 = vmul.f32 %v1182_v38, %v4358_v56 }
 0x3a1   : > { %v1188_v26 = vmul.f32 %v1182_v38, %v3593_v35  ;;  %v1187_v39 = vmul.f32 %v1182_v38, %v4359_v34  ;;  %v1190_v14 = vmul.f32 %v1182_v38, %v3617_v54  ;;  %v1189_v62 = vmul.f32 %v1182_v38, %v3599_v40 }
 0x3a2   : > { %v1196_v5 = vadd.f32 %v1184_v53, %v1168_v8  ;;  %v1195_v6 = vadd.f32 %v1183_v0, %v1167_v3  ;;  %v1198_v33 = vadd.f32 %v1186_v36, %v1170_v52  ;;  %v1197_v19 = vadd.f32 %v1185_v28, %v1169_v16  ;;  %v2494_v52 = vld [vmem:[%s3534_s19 + $0xc0] sm:$0xff]  ;;  %v2493_v0 = vld [vmem:[%s3534_s19 + $0xb8] sm:$0xff] }
 0x3a3   : > { %v1200_v21 = vadd.f32 %v1188_v26, %v1172_v44  ;;  %v1199_v17 = vadd.f32 %v1187_v39, %v1171_v50  ;;  %v1202_v29 = vadd.f32 %v1190_v14, %v1174_v11  ;;  %v1201_v51 = vadd.f32 %v1189_v62, %v1173_v15 }
 0x3a4   : > { %v1333_v56 = vadd.f32 %v3776_v10, %v1196_v5  ;;  %v1332_v35 = vadd.f32 %v3778_v12, %v1195_v6  ;;  %v1335_v34 = vadd.f32 %v3780_v13, %v1198_v33  ;;  %v1334_v54 = vadd.f32 %v3782_v18, %v1197_v19 }
 0x3a5   : > { %v1361_v40 = vadd.f32 %v2754_v22, %v1200_v21  ;;  %v1360_v8 = vadd.f32 %v1293_v24, %v1199_v17  ;;  %v1363_v3 = vadd.f32 %v2757_v41, %v1202_v29  ;;  %v1362_v53 = vadd.f32 %v1303_v1, %v1201_v51 }
 0x3a6   : > { %v2511_v16 = vmul.f32 -1.442695, %v1333_v56  ;;  %v2510_v44 = vmul.f32 -1.442695, %v1332_v35  ;;  %v2513_v50 = vmul.f32 -1.442695, %v1335_v34  ;;  %v1192_v15 = vmul.f32 %v1182_v38, %v3661_v59 }
 0x3a7   : > { %v2512_v11 = vmul.f32 -1.442695, %v1334_v54  ;;  %v1175_v10 = vadd.f32 %v2491_v57, %v1163_v2  ;;  %v1191_v12 = vmul.f32 %v1182_v38, %v3651_v32  ;;  %v1178_v36 = vadd.f32 %v2494_v52, %v1166_v43 }
 0x3a8   : > { %3019 = vpow2.f32 %v2511_v16  ;;  %v1204_v13 = vadd.f32 %v1192_v15, %v1176_v61  ;;  %v1177_v18 = vadd.f32 %v2493_v0, %v1165_v42  ;;  %v1194_v29 = vmul.f32 %v1182_v38, %v3682_v30 }
 0x3a9   : > { %3021 = vpow2.f32 %v2510_v44  ;;  %v1203_v22 = vadd.f32 %v1191_v12, %v1175_v10  ;;  %v1193_v24 = vmul.f32 %v1182_v38, %v3672_v48  ;;  %v2515_v35 = vmul.f32 -1.442695, %v1361_v40 }
 0x3aa   : > { %3023 = vpow2.f32 %v2513_v50  ;;  %v1206_v41 = vadd.f32 %v1194_v29, %v1178_v36  ;;  %v2514_v51 = vmul.f32 -1.442695, %v1360_v8  ;;  %v2517_v54 = vmul.f32 -1.442695, %v1363_v3 }
 0x3ab   : > { %3025 = vpow2.f32 %v2512_v11  ;;  %v1205_v1 = vadd.f32 %v1193_v24, %v1177_v18  ;;  %v2516_v57 = vmul.f32 -1.442695, %v1362_v53  ;;  %v1389_v6 = vadd.f32 %v3796_v58, %v3666_v31 }
 0x3ac   : > { %3027 = vpow2.f32 %v2515_v35  ;;  %v1388_v21 = vadd.f32 %v3805_v47, %v3664_v20  ;;  %v1391_v53 = vadd.f32 %v3815_v7, %v3704_v9  ;;  %v1390_v16 = vadd.f32 %v3820_v23, %v3687_v60 }
 0x3ad   : > { %3029 = vpow2.f32 %v2514_v51 }
 0x3ae   : > { %3031 = vpow2.f32 %v2517_v54 }
 0x3af   : > { %3033 = vpow2.f32 %v2516_v57 }
 0x3b2   : > { %v3020_v2 = vpop.eup %3019 }
 0x3b3   : > { %v3022_v61 = vpop.eup %3021  ;;  %v1349_v43 = vadd.f32 1.0, %v3020_v2 }
 0x3b4   : > { %v3024_v42 = vpop.eup %3023  ;;  %v1348_v17 = vadd.f32 1.0, %v3022_v61 }
 0x3b5   : > { %v3026_v56 = vpop.eup %3025  ;;  %3035 = vrcp.f32 %v1349_v43  ;;  %v1351_v38 = vadd.f32 1.0, %v3024_v42 }
 0x3b6   : > { %3037 = vrcp.f32 %v1348_v17  ;;  %v1350_v28 = vadd.f32 1.0, %v3026_v56  ;;  %v3028_v40 = vpop.eup %3027 }
 0x3b7   : > { %3039 = vrcp.f32 %v1351_v38  ;;  %v3030_v26 = vpop.eup %3029  ;;  %v1377_v14 = vadd.f32 1.0, %v3028_v40  ;;  %v4361_v40 = vmov 0.0  }
 0x3b8   : > { %3041 = vrcp.f32 %v1350_v28  ;;  %v3032_v34 = vpop.eup %3031  ;;  %v1376_v62 = vadd.f32 1.0, %v3030_v26 }
 0x3b9   : > { %v3034_v39 = vpop.eup %3033  ;;  %v1379_v5 = vadd.f32 1.0, %v3032_v34  ;;  %3043 = vrcp.f32 %v1377_v14  ;;  %v4362_v34 = vld [vmem:[#allocation29_spill] sm:$0xff] }
 0x3ba   : > { %v1378_v19 = vadd.f32 1.0, %v3034_v39  ;;  %3045 = vrcp.f32 %v1376_v62 }
 0x3bb   : > { %3047 = vrcp.f32 %v1379_v5  ;;  %v2532_v5 = vld [vmem:[%s3534_s19 + $0x130] sm:$0x3] }
 0x3bc   : > { %3049 = vrcp.f32 %v1378_v19 }
 0x3bf   : > { %v3036_v33 = vpop.eup %3035 }
 0x3c0   : > { %v3038_v8 = vpop.eup %3037  ;;  %v1393_v3 = vmul.f32 %v3036_v33, %v1389_v6  ;;  %v4363_v6 = vld [vmem:[#allocation7_spill] sm:$0xff] }
 0x3c1   : > { %v3040_v52 = vpop.eup %3039  ;;  %v1392_v0 = vmul.f32 %v3038_v8, %v1388_v21  ;;  %v3889_v8 = vld [vmem:[%s4251_s3] sm:$0xff] }
 0x3c2   : > { %v3042_v44 = vpop.eup %3041  ;;  %v1397_v58 = vadd.f32 %v1393_v3, %v1204_v13  ;;  %v1395_v50 = vmul.f32 %v3040_v52, %v1391_v53  ;;  %v3897_v3 = vld [vmem:[%s4251_s3 + $0x8] sm:$0xff]  ;;  %v3904_v53 = vld [vmem:[%s4251_s3 + $0x10] sm:$0xff]  ;;  %v3911_v52 = vld [vmem:[%s4251_s3 + $0x18] sm:$0xff] }
 0x3c3   : > { %v1396_v15 = vadd.f32 %v1392_v0, %v1203_v22  ;;  %v1394_v11 = vmul.f32 %v3042_v44, %v1390_v16  ;;  %v3044_v7 = vpop.eup %3043  ;;  %4365 = vst [vmem:[#allocation29_spill] sm:$0xff] %v3897_v3  ;;  %4366 = vst [vmem:[#allocation30_spill] sm:$0xff] %v3904_v53  ;;  %v3918_v0 = vld [vmem:[%s4251_s3 + $0x20] sm:$0xff]  ;;  %v3925_v16 = vld [vmem:[%s4251_s3 + $0x28] sm:$0xff] }
 0x3c4   : > { %3051 = vtanh.f32 %v1397_v58  ;;  %v1399_v47 = vadd.f32 %v1395_v50, %v1206_v41  ;;  %v3046_v12 = vpop.eup %3045  ;;  %v1405_v29 = vsub.f32 1.0, %v3044_v7  ;;  %v1413_v13 = vmul.f32 %v3044_v7, %v3712_v49  ;;  %4367 = vst [vmem:[#allocation31_spill] sm:$0xff] %v3911_v52  ;;  %4368 = vst [vmem:[#allocation32_spill] sm:$0xff] %v3918_v0  ;;  %v3932_v44 = vld [vmem:[%s4251_s3 + $0x30] sm:$0xff]  ;;  %v3939_v58 = vld [vmem:[%s4251_s3 + $0x38] sm:$0xff] }
 0x3c5   : > { %3053 = vtanh.f32 %v1396_v15  ;;  %v1398_v10 = vadd.f32 %v1394_v11, %v1205_v1  ;;  %v3048_v36 = vpop.eup %3047  ;;  %v1404_v23 = vsub.f32 1.0, %v3046_v12  ;;  %v1412_v41 = vmul.f32 %v3046_v12, %v3710_v25  ;;  %4369 = vst [vmem:[#allocation33_spill] sm:$0xff] %v3925_v16  ;;  %4370 = vst [vmem:[#allocation34_spill] sm:$0xff] %v3932_v44  ;;  %v3946_v50 = vld [vmem:[%s4251_s3 + $0x40] sm:$0xff]  ;;  %v3953_v15 = vld [vmem:[%s4251_s3 + $0x48] sm:$0xff] }
 0x3c6   : > { %3055 = vtanh.f32 %v1399_v47  ;;  %v3050_v18 = vpop.eup %3049  ;;  %v1407_v54 = vsub.f32 1.0, %v3048_v36  ;;  %v1415_v42 = vmul.f32 %v3048_v36, %v3716_v27  ;;  %4371 = vst [vmem:[#allocation35_spill] sm:$0xff] %v3939_v58  ;;  %4372 = vst [vmem:[#allocation36_spill] sm:$0xff] %v3946_v50  ;;  %v3960_v11 = vld [vmem:[%s4251_s3 + $0x50] sm:$0xff]  ;;  %v3967_v47 = vld [vmem:[%s4251_s3 + $0x58] sm:$0xff] }
 0x3c7   : > { %3057 = vtanh.f32 %v1398_v10  ;;  %v1406_v2 = vsub.f32 1.0, %v3050_v18  ;;  %v1414_v38 = vmul.f32 %v3050_v18, %v3708_v4  ;;  %v4360_v4 = vld [vmem:[#allocation6_spill] sm:$0xff]  ;;  %4373 = vst [vmem:[#allocation37_spill] sm:$0xff] %v3953_v15  ;;  %4374 = vst [vmem:[#allocation38_spill] sm:$0xff] %v3960_v11 }
 0x3c8   : > { %4364 = vst [vmem:[#allocation6_spill] sm:$0xff] %v3889_v8  ;;  %4375 = vst [vmem:[#allocation39_spill] sm:$0xff] %v3967_v47 }
 0x3ce   : > { %v3052_v24 = vpop.eup %3051 }
 0x3cf   : > { %v3054_v35 = vpop.eup %3053  ;;  %v1409_v51 = vmul.f32 %v3052_v24, %v1405_v29 }
 0x3d0   : > { %v3056_v22 = vpop.eup %3055  ;;  %v1408_v57 = vmul.f32 %v3054_v35, %v1404_v23 }
 0x3d1   : > { %v3058_v1 = vpop.eup %3057  ;;  %v3855_v61 = vadd.f32 %v1413_v13, %v1409_v51  ;;  %v1411_v43 = vmul.f32 %v3056_v22, %v1407_v54 }
 0x3d2   : > { %v3858_v17 = vadd.f32 %v1412_v41, %v1408_v57  ;;  %v1410_v56 = vmul.f32 %v3058_v1, %v1406_v2  ;;  %v4376_v41 = vld [vmem:[#allocation8_spill] sm:$0xff] }
 0x3d3   : > { %v3861_v28 = vadd.f32 %v1415_v42, %v1411_v43  ;;  %v2521_v1 = vld [vmem:[%s3534_s19 + $0xd8] sm:$0xff]  ;;  %v2520_v43 = vld [vmem:[%s3534_s19 + $0xd0] sm:$0xff]  ;;  %v4377_v42 = vld [vmem:[#allocation9_spill] sm:$0xff] }
 0x3d4   : > { %v2884_v49 = vpack.c.bf16 %v3855_v61, %v3858_v17  ;;  %v3865_v25 = vadd.f32 %v1414_v38, %v1410_v56  ;;  %v4378_v38 = vld [vmem:[#allocation13_spill] sm:$0xff] }
 0x3d6   : > { %2885 = vmatpush3.bf16.msra.mxu1 %v2884_v49  ;;  %v2887_v27 = vpack.c.bf16 %v3861_v28, %v3865_v25 }
 0x3d7   : > { %2886 = vmatprep.subr.bf16.mxu1 %v4347_v63 }
 0x3da   : > { %2888 = vmatpush3.bf16.msra.mxu1 %v2887_v27 }
 0x3db   : > { %2889 = vmatprep.subr.bf16.mxu1 %v4347_v63 }
 0x3dd   : > { %2773 = vmatmul.mubr.msk.f32.vlgmr.msra.gmra.mrb[14].mxu1 %vm700_vm0, %v3724_v55 }
 0x3de   : > { %2891 = vmatpush3.bf16.msra.mxu1 %v4360_v4  ;;  %2779 = vmatprep.mubr.msk.f32.mxu1 %vm3227_vm1, %v4361_v40 }
 0x3df   : > { %2893 = vmatprep.subr.bf16.mxu1 %v2884_v49 }
 0x4b0   : > { %v1486_v26 = vpop.f32.mrb[14].mxu1 }
 0x4b1   : > { %v1487_v39 = vadd.f32 %v1486_v26, %v4362_v34  ;;  %v2774_v14 = vpop.f32.mrb[15].mxu1 }
 0x4b3   : > { %2519 = vst.msk [vmem:[%s3738_s28 + $0x1] sm:$0x1] %vm1052_vm3, %v1487_v39  ;;  %v3880_v62 = vrot.slane %v1487_v39, %v3609_v46  ;;  %v4380_v39 = vld [vmem:[#allocation17_spill] sm:$0xff] }
 0x4b5   : > { %v1510_v33 = vmul.f32 %v3880_v62, %v4363_v6  ;;  %v1594_v2 = vmul.f32 %v3880_v62, %v4376_v41  ;;  %v1593_v56 = vmul.f32 %v3880_v62, %v4377_v42  ;;  %v1598_v14 = vmul.f32 %v3880_v62, %v4380_v39  ;;  %v4383_v42 = vld [vmem:[#allocation20_spill] sm:$0xff]  ;;  %v4384_v41 = vld [vmem:[#allocation26_spill] sm:$0xff] }
 0x4b6   : > { %v1602_v39 = vmul.f32 %v3880_v62, %v4384_v41 }
 0x4b7   : > { %v1511_v19 = vadd.f32 %v2532_v5, %v1510_v33  ;;  %v2523_v33 = vld [vmem:[%s3534_s19 + $0xe8] sm:$0xff] }
 0x4b9   : > { %v1513_v21 = vrot.slane %v1511_v19, 1 }
 0x4bb   : > { %2780 = vmatmul.mubr.msk.f32.vlgmr.msra.gmra.mrb[16].mxu1 %vm448_vm2, %v1513_v21  ;;  %v2525_v21 = vld [vmem:[%s3534_s19 + $0xf8] sm:$0xff] }
 0x4bc   : > { %2895 = vmatpush3.bf16.msra.mxu1 %v2884_v49  ;;  %2790 = vmatprep.mubr.msk.f32.mxu1 %vm700_vm0, %v3889_v8  ;;  %v1596_v49 = vmul.f32 %v3880_v62, %v4378_v38  ;;  %v2527_v38 = vld [vmem:[%s3534_s19 + $0x108] sm:$0xff] }
 0x4bd   : > { %2897 = vmatprep.subr.bf16.mxu1 %v2887_v27 }
 0x4c0   : > { %2899 = vmatpush3.bf16.msra.mxu1 %v2887_v27  ;;  %v4379_v27 = vld [vmem:[#allocation12_spill] sm:$0xff] }
 0x4c1   : > { %2917 = vmatprep.subr.bf16.mxu1 %v4347_v63  ;;  %v1595_v26 = vmul.f32 %v3880_v62, %v4379_v27  ;;  %v1599_v27 = vmul.f32 %v3880_v62, %v4383_v42  ;;  %v1601_v42 = vmul.f32 %v3880_v62, %v3627_v37 }
 0x4c3   : > { %2791 = vmatmul.mubr.msk.f32.vlgmr.msra.gmra.mrb[18].mxu1 %vm700_vm0, %v3897_v3 }
 0x4c4   : > { %2793 = vmatprep.mubr.msk.f32.mxu1 %vm700_vm0, %v3904_v53 }
 0x4c7   : > { %2794 = vmatmul.mubr.msk.f32.gmra.mrb[20].mxu1 %vm700_vm0, %v3911_v52 }
 0x4c8   : > { %2796 = vmatprep.mubr.msk.f32.mxu1 %vm700_vm0, %v3918_v0 }
 0x4cb   : > { %2797 = vmatmul.mubr.msk.f32.gmra.mrb[22].mxu1 %vm700_vm0, %v3925_v16  ;;  %v1610_v16 = vadd.f32 %v2525_v21, %v1598_v14  ;;  %v4387_v14 = vld [vmem:[#allocation10_spill] sm:$0xff] }
 0x4cc   : > { %2799 = vmatprep.mubr.msk.f32.mxu1 %vm700_vm0, %v3932_v44  ;;  %v1608_v44 = vadd.f32 %v2523_v33, %v1596_v49  ;;  %v4386_v49 = vld [vmem:[#allocation11_spill] sm:$0xff] }
 0x4cf   : > { %2800 = vmatmul.mubr.msk.f32.gmra.mrb[24].mxu1 %vm700_vm0, %v3939_v58  ;;  %v1605_v58 = vadd.f32 %v2520_v43, %v1593_v56  ;;  %v4385_v43 = vld [vmem:[#allocation27_spill] sm:$0xff] }
 0x4d0   : > { %2802 = vmatprep.mubr.msk.f32.mxu1 %vm700_vm0, %v3946_v50  ;;  %v1603_v56 = vmul.f32 %v3880_v62, %v4385_v43 }
 0x4d3   : > { %2803 = vmatmul.mubr.msk.f32.gmra.mrb[26].mxu1 %vm700_vm0, %v3953_v15  ;;  %v2529_v15 = vld [vmem:[%s3534_s19 + $0x118] sm:$0xff] }
 0x4d4   : > { %2805 = vmatprep.mubr.msk.f32.mxu1 %vm700_vm0, %v3960_v11  ;;  %v2526_v11 = vld [vmem:[%s3534_s19 + $0x100] sm:$0xff] }
 0x4d5   : > { %v1611_v41 = vadd.f32 %v2526_v11, %v1599_v27 }
 0x4d7   : > { %2806 = vmatmul.mubr.msk.f32.gmra.mrb[28].mxu1 %vm700_vm0, %v3967_v47  ;;  %v1606_v47 = vadd.f32 %v2521_v1, %v1594_v2  ;;  %v1614_v2 = vadd.f32 %v2529_v15, %v1602_v39  ;;  %v1604_v1 = vmul.f32 %v3880_v62, %v3670_v45  ;;  %v4392_v15 = vld [vmem:[#allocation24_spill] sm:$0xff]  ;;  %v4393_v39 = vld [vmem:[#allocation22_spill] sm:$0xff] }
 0x4d8   : > { %2860 = vmatprep.mubr.msk.f32.mxu1 %vm3227_vm1, %v4361_v40 }
 0x58e   : > { %v1582_v10 = vpop.f32.mrb[16].mxu1 }
 0x58f   : > { %v1586_v7 = vadd.f32 %v1582_v10, %v1511_v19  ;;  %v2781_v12 = vpop.f32.mrb[17].mxu1  ;;  %v2522_v19 = vld [vmem:[%s3534_s19 + $0xe0] sm:$0xff] }
 0x590   : > { %v4381_v10 = vld [vmem:[#allocation16_spill] sm:$0xff]  ;;  %v4382_v12 = vld [vmem:[#allocation21_spill] sm:$0xff] }
 0x591   : > { %v2534_v36 = vmul.f32 -1.442695, %v1586_v7  ;;  %v1597_v7 = vmul.f32 %v3880_v62, %v4381_v10  ;;  %v1607_v10 = vadd.f32 %v2522_v19, %v1595_v26 }
 0x593   : > { %3059 = vpow2.f32 %v2534_v36  ;;  %v1600_v36 = vmul.f32 %v3880_v62, %v4382_v12 }
 0x595   : > { %v1612_v53 = vadd.f32 %v2527_v38, %v1600_v36  ;;  %v4389_v38 = vld [vmem:[#allocation14_spill] sm:$0xff] }
 0x596   : > { %v3973_v18 = vpop.f32.mrb[18].mxu1 }
 0x597   : > { %v3975_v29 = vpop.f32.mrb[19].mxu1 }
 0x59a   : > { %v3977_v24 = vpop.f32.mrb[20].mxu1 }
 0x59b   : > { %v3979_v23 = vpop.f32.mrb[21].mxu1 }
 0x59d   : > { %v3060_v35 = vpop.eup %3059 }
 0x59e   : > { %v1590_v51 = vadd.f32 1.0, %v3060_v35  ;;  %v2798_v13 = vpop.f32.mrb[22].mxu1 }
 0x59f   : > { %v1731_v54 = vpop.f32.mrb[23].mxu1 }
 0x5a0   : > { %3061 = vrcp.f32 %v1590_v51  ;;  %v2524_v51 = vld [vmem:[%s3534_s19 + $0xf0] sm:$0xff] }
 0x5a1   : > { %v1609_v52 = vadd.f32 %v2524_v51, %v1597_v7  ;;  %v4390_v7 = vld [vmem:[#allocation19_spill] sm:$0xff]  ;;  %v4391_v51 = vld [vmem:[#allocation18_spill] sm:$0xff] }
 0x5a2   : > { %v2801_v22 = vpop.f32.mrb[24].mxu1 }
 0x5a3   : > { %v1741_v57 = vpop.f32.mrb[25].mxu1 }
 0x5a6   : > { %v3993_v5 = vpop.f32.mrb[26].mxu1 }
 0x5a7   : > { %v4002_v35 = vpop.f32.mrb[27].mxu1 }
 0x5aa   : > { %v3062_v50 = vpop.eup %3061  ;;  %v4012_v0 = vpop.f32.mrb[28].mxu1 }
 0x5ab   : > { %v1620_v12 = vrot.slane %v3062_v50, %v3609_v46  ;;  %v4017_v3 = vpop.f32.mrb[29].mxu1  ;;  %v4388_v50 = vld [vmem:[#allocation15_spill] sm:$0xff] }
 0x5ac   : > { %v2528_v46 = vld [vmem:[%s3534_s19 + $0x110] sm:$0xff] }
 0x5ad   : > { %v1622_v26 = vmul.f32 %v1620_v12, %v4386_v49  ;;  %v1621_v33 = vmul.f32 %v1620_v12, %v4387_v14  ;;  %v1624_v19 = vmul.f32 %v1620_v12, %v4388_v50  ;;  %v1623_v21 = vmul.f32 %v1620_v12, %v4389_v38 }
 0x5ae   : > { %v1626_v36 = vmul.f32 %v1620_v12, %v4390_v7  ;;  %v1625_v11 = vmul.f32 %v1620_v12, %v4391_v51  ;;  %v1628_v27 = vmul.f32 %v1620_v12, %v4392_v15  ;;  %v1627_v45 = vmul.f32 %v1620_v12, %v4393_v39 }
 0x5af   : > { %v1634_v37 = vadd.f32 %v1622_v26, %v1606_v47  ;;  %v1633_v8 = vadd.f32 %v1621_v33, %v1605_v58  ;;  %v1636_v62 = vadd.f32 %v1624_v19, %v1608_v44  ;;  %v1635_v49 = vadd.f32 %v1623_v21, %v1607_v10  ;;  %v2531_v44 = vld [vmem:[%s3534_s19 + $0x128] sm:$0xff]  ;;  %v2530_v33 = vld [vmem:[%s3534_s19 + $0x120] sm:$0xff] }
 0x5b0   : > { %v1638_v14 = vadd.f32 %v1626_v36, %v1610_v16  ;;  %v1637_v43 = vadd.f32 %v1625_v11, %v1609_v52  ;;  %v1640_v50 = vadd.f32 %v1628_v27, %v1612_v53  ;;  %v1639_v6 = vadd.f32 %v1627_v45, %v1611_v41 }
 0x5b1   : > { %v1771_v38 = vadd.f32 %v3973_v18, %v1634_v37  ;;  %v1770_v7 = vadd.f32 %v3975_v29, %v1633_v8  ;;  %v1773_v51 = vadd.f32 %v3977_v24, %v1636_v62  ;;  %v1772_v15 = vadd.f32 %v3979_v23, %v1635_v49 }
 0x5b2   : > { %v1799_v39 = vadd.f32 %v2798_v13, %v1638_v14  ;;  %v1798_v47 = vadd.f32 %v1731_v54, %v1637_v43  ;;  %v1801_v58 = vadd.f32 %v2801_v22, %v1640_v50  ;;  %v1800_v26 = vadd.f32 %v1741_v57, %v1639_v6 }
 0x5b3   : > { %v2548_v10 = vmul.f32 -1.442695, %v1771_v38  ;;  %v2547_v16 = vmul.f32 -1.442695, %v1770_v7  ;;  %v2550_v52 = vmul.f32 -1.442695, %v1773_v51  ;;  %v1630_v45 = vmul.f32 %v1620_v12, %v3661_v59 }
 0x5b4   : > { %v2549_v53 = vmul.f32 -1.442695, %v1772_v15  ;;  %v1613_v37 = vadd.f32 %v2528_v46, %v1601_v42  ;;  %v1629_v8 = vmul.f32 %v1620_v12, %v3651_v32  ;;  %v1616_v29 = vadd.f32 %v2531_v44, %v1604_v1 }
 0x5b5   : > { %3063 = vpow2.f32 %v2548_v10  ;;  %v1642_v18 = vadd.f32 %v1630_v45, %v1614_v2  ;;  %v1615_v24 = vadd.f32 %v2530_v33, %v1603_v56  ;;  %v1632_v13 = vmul.f32 %v1620_v12, %v3682_v30 }
 0x5b6   : > { %3065 = vpow2.f32 %v2547_v16  ;;  %v1641_v23 = vadd.f32 %v1629_v8, %v1613_v37  ;;  %v1631_v6 = vmul.f32 %v1620_v12, %v3672_v48  ;;  %v2552_v54 = vmul.f32 -1.442695, %v1799_v39 }
 0x5b7   : > { %3067 = vpow2.f32 %v2550_v52  ;;  %v1644_v22 = vadd.f32 %v1632_v13, %v1616_v29  ;;  %v2551_v41 = vmul.f32 -1.442695, %v1798_v47  ;;  %v2554_v43 = vmul.f32 -1.442695, %v1801_v58 }
 0x5b8   : > { %3069 = vpow2.f32 %v2549_v53  ;;  %v1643_v57 = vadd.f32 %v1631_v6, %v1615_v24  ;;  %v2553_v46 = vmul.f32 -1.442695, %v1800_v26  ;;  %v1827_v15 = vadd.f32 %v3993_v5, %v3666_v31 }
 0x5b9   : > { %3071 = vpow2.f32 %v2552_v54  ;;  %v1826_v62 = vadd.f32 %v4002_v35, %v3664_v20  ;;  %v1829_v26 = vadd.f32 %v4012_v0, %v3704_v9  ;;  %v1828_v10 = vadd.f32 %v4017_v3, %v3687_v60 }
 0x5ba   : > { %3073 = vpow2.f32 %v2551_v41 }
 0x5bb   : > { %3075 = vpow2.f32 %v2554_v43 }
 0x5bc   : > { %3077 = vpow2.f32 %v2553_v46 }
 0x5bf   : > { %v3064_v42 = vpop.eup %3063 }
 0x5c0   : > { %v3066_v2 = vpop.eup %3065  ;;  %v1787_v1 = vadd.f32 1.0, %v3064_v42 }
 0x5c1   : > { %v3068_v56 = vpop.eup %3067  ;;  %v1786_v49 = vadd.f32 1.0, %v3066_v2 }
 0x5c2   : > { %v3070_v14 = vpop.eup %3069  ;;  %3079 = vrcp.f32 %v1787_v1  ;;  %v1789_v12 = vadd.f32 1.0, %v3068_v56 }
 0x5c3   : > { %3081 = vrcp.f32 %v1786_v49  ;;  %v1788_v50 = vadd.f32 1.0, %v3070_v14  ;;  %v3072_v19 = vpop.eup %3071 }
 0x5c4   : > { %3083 = vrcp.f32 %v1789_v12  ;;  %v3074_v38 = vpop.eup %3073  ;;  %v1815_v36 = vadd.f32 1.0, %v3072_v19 }
 0x5c5   : > { %3085 = vrcp.f32 %v1788_v50  ;;  %v3076_v21 = vpop.eup %3075  ;;  %v1814_v51 = vadd.f32 1.0, %v3074_v38 }
 0x5c6   : > { %v3078_v7 = vpop.eup %3077  ;;  %v1817_v11 = vadd.f32 1.0, %v3076_v21  ;;  %3087 = vrcp.f32 %v1815_v36  ;;  %v4394_v21 = vld [vmem:[#allocation23_spill] sm:$0xff] }
 0x5c7   : > { %v1816_v39 = vadd.f32 1.0, %v3078_v7  ;;  %3089 = vrcp.f32 %v1814_v51  ;;  %v2569_v36 = vld [vmem:[%s3534_s19 + $0x198] sm:$0x3] }
 0x5c8   : > { %3091 = vrcp.f32 %v1817_v11  ;;  %v4395_v51 = vld [vmem:[#allocation7_spill] sm:$0xff] }
 0x5c9   : > { %3093 = vrcp.f32 %v1816_v39  ;;  %v4399_v39 = vld [vmem:[#allocation31_spill] sm:$0xff] }
 0x5cc   : > { %v3080_v27 = vpop.eup %3079 }
 0x5cd   : > { %v3082_v47 = vpop.eup %3081  ;;  %v1831_v58 = vmul.f32 %v3080_v27, %v1827_v15  ;;  %v4398_v27 = vld [vmem:[#allocation30_spill] sm:$0xff] }
 0x5ce   : > { %v3084_v44 = vpop.eup %3083  ;;  %v1830_v33 = vmul.f32 %v3082_v47, %v1826_v62  ;;  %v4400_v62 = vld [vmem:[#allocation32_spill] sm:$0xff]  ;;  %v4401_v47 = vld [vmem:[#allocation33_spill] sm:$0xff] }
 0x5cf   : > { %v3086_v16 = vpop.eup %3085  ;;  %v1835_v5 = vadd.f32 %v1831_v58, %v1642_v18  ;;  %v1833_v52 = vmul.f32 %v3084_v44, %v1829_v26  ;;  %v4402_v58 = vld [vmem:[#allocation34_spill] sm:$0xff]  ;;  %v4403_v26 = vld [vmem:[#allocation35_spill] sm:$0xff]  ;;  %v4404_v44 = vld [vmem:[#allocation36_spill] sm:$0xff] }
 0x5d0   : > { %v1834_v45 = vadd.f32 %v1830_v33, %v1641_v23  ;;  %v1832_v53 = vmul.f32 %v3086_v16, %v1828_v10  ;;  %v3088_v0 = vpop.eup %3087  ;;  %v4405_v33 = vld [vmem:[#allocation37_spill] sm:$0xff]  ;;  %v4406_v10 = vld [vmem:[#allocation38_spill] sm:$0xff]  ;;  %v4407_v16 = vld [vmem:[#allocation39_spill] sm:$0xff] }
 0x5d1   : > { %3095 = vtanh.f32 %v1835_v5  ;;  %v1837_v35 = vadd.f32 %v1833_v52, %v1644_v22  ;;  %v3090_v8 = vpop.eup %3089  ;;  %v1843_v13 = vsub.f32 1.0, %v3088_v0  ;;  %v1851_v18 = vmul.f32 %v3088_v0, %v3855_v61 }
 0x5d2   : > { %3097 = vtanh.f32 %v1834_v45  ;;  %v1836_v37 = vadd.f32 %v1832_v53, %v1643_v57  ;;  %v3092_v29 = vpop.eup %3091  ;;  %v1842_v3 = vsub.f32 1.0, %v3090_v8  ;;  %v1850_v22 = vmul.f32 %v3090_v8, %v3858_v17 }
 0x5d3   : > { %3099 = vtanh.f32 %v1837_v35  ;;  %v3094_v24 = vpop.eup %3093  ;;  %v1845_v43 = vsub.f32 1.0, %v3092_v29  ;;  %v1853_v56 = vmul.f32 %v3092_v29, %v3861_v28 }
 0x5d4   : > { %3101 = vtanh.f32 %v1836_v37  ;;  %v1844_v42 = vsub.f32 1.0, %v3094_v24  ;;  %v1852_v12 = vmul.f32 %v3094_v24, %v3865_v25 }
 0x5db   : > { %v3096_v6 = vpop.eup %3095 }
 0x5dc   : > { %v3098_v54 = vpop.eup %3097  ;;  %v1847_v41 = vmul.f32 %v3096_v6, %v1843_v13 }
 0x5dd   : > { %v3100_v23 = vpop.eup %3099  ;;  %v1846_v46 = vmul.f32 %v3098_v54, %v1842_v3 }
 0x5de   : > { %v3102_v57 = vpop.eup %3101  ;;  %v4052_v2 = vadd.f32 %v1851_v18, %v1847_v41  ;;  %v1849_v1 = vmul.f32 %v3100_v23, %v1845_v43  ;;  %v4408_v41 = vld [vmem:[#allocation8_spill] sm:$0xff] }
 0x5df   : > { %v4055_v49 = vadd.f32 %v1850_v22, %v1846_v46  ;;  %v1848_v14 = vmul.f32 %v3102_v57, %v1844_v42  ;;  %v2558_v43 = vld [vmem:[%s3534_s19 + $0x140] sm:$0xff]  ;;  %v2557_v23 = vld [vmem:[%s3534_s19 + $0x138] sm:$0xff] }
 0x5e0   : > { %v4058_v50 = vadd.f32 %v1853_v56, %v1849_v1  ;;  %v4409_v46 = vld [vmem:[#allocation9_spill] sm:$0xff]  ;;  %v4411_v1 = vld [vmem:[#allocation12_spill] sm:$0xff] }
 0x5e1   : > { %v2901_v61 = vpack.c.bf16 %v4052_v2, %v4055_v49  ;;  %v4062_v17 = vadd.f32 %v1852_v12, %v1848_v14  ;;  %v4410_v42 = vld [vmem:[#allocation13_spill] sm:$0xff] }
 0x5e2   : > { %v4412_v14 = vld [vmem:[#allocation17_spill] sm:$0xff] }
 0x5e3   : > { %2902 = vmatpush3.bf16.msra.mxu0 %v2901_v61  ;;  %v2904_v28 = vpack.c.bf16 %v4058_v50, %v4062_v17 }
 0x5e4   : > { %2903 = vmatprep.subr.bf16.mxu0 %v4347_v63 }
 0x5e7   : > { %2905 = vmatpush3.bf16.msra.mxu0 %v2904_v28 }
 0x5e8   : > { %2906 = vmatprep.subr.bf16.mxu0 %v4347_v63 }
 0x5ea   : > { %2817 = vmatmul.mubr.msk.f32.vlgmr.msra.gmra.mrb[16].mxu0 %vm700_vm0, %v3724_v55 }
 0x5eb   : > { %2908 = vmatpush3.bf16.msra.mxu0 %v4360_v4  ;;  %2823 = vmatprep.mubr.msk.f32.mxu0 %vm3227_vm1, %v4361_v40  ;;  %v4396_v4 = vld [vmem:[#allocation6_spill] sm:$0xff]  ;;  %v4397_v40 = vld [vmem:[#allocation29_spill] sm:$0xff] }
 0x5ec   : > { %2910 = vmatprep.subr.bf16.mxu0 %v2901_v61 }
 0x6bd   : > { %v1924_v25 = vpop.f32.mrb[16].mxu0 }
 0x6be   : > { %v1925_v19 = vadd.f32 %v1924_v25, %v4362_v34  ;;  %v2818_v38 = vpop.f32.mrb[17].mxu0  ;;  %v2559_v25 = vld [vmem:[%s3534_s19 + $0x148] sm:$0xff] }
 0x6bf   : > { %v4413_v38 = vld [vmem:[#allocation16_spill] sm:$0xff] }
 0x6c0   : > { %2556 = vst.msk [vmem:[%s3738_s28 + $0x2] sm:$0x1] %vm1052_vm3, %v1925_v19  ;;  %v4077_v7 = vrot.slane %v1925_v19, %v4394_v21  ;;  %v2562_v19 = vld [vmem:[%s3534_s19 + $0x160] sm:$0xff] }
 0x6c2   : > { %v1948_v11 = vmul.f32 %v4077_v7, %v4395_v51  ;;  %v2032_v18 = vmul.f32 %v4077_v7, %v4408_v41  ;;  %v2031_v22 = vmul.f32 %v4077_v7, %v4409_v46  ;;  %v2034_v57 = vmul.f32 %v4077_v7, %v4410_v42  ;;  %v4414_v51 = vld [vmem:[#allocation21_spill] sm:$0xff] }
 0x6c3   : > { %v2033_v56 = vmul.f32 %v4077_v7, %v4411_v1  ;;  %v2036_v12 = vmul.f32 %v4077_v7, %v4412_v14  ;;  %v4421_v14 = vld [vmem:[#allocation10_spill] sm:$0xff] }
 0x6c4   : > { %v1949_v55 = vadd.f32 %v2569_v36, %v1948_v11  ;;  %v2035_v36 = vmul.f32 %v4077_v7, %v4413_v38  ;;  %v2038_v11 = vmul.f32 %v4077_v7, %v4414_v51  ;;  %v4424_v38 = vld [vmem:[#allocation19_spill] sm:$0xff]  ;;  %v4425_v51 = vld [vmem:[#allocation18_spill] sm:$0xff] }
 0x6c6   : > { %v1951_v15 = vrot.slane %v1949_v55, 1 }
 0x6c8   : > { %2824 = vmatmul.mubr.msk.f32.vlgmr.msra.gmra.mrb[18].mxu0 %vm448_vm2, %v1951_v15  ;;  %v2561_v15 = vld [vmem:[%s3534_s19 + $0x158] sm:$0xff] }
 0x6c9   : > { %2912 = vmatpush3.bf16.msra.mxu0 %v2901_v61  ;;  %2834 = vmatprep.mubr.msk.f32.mxu0 %vm700_vm0, %v4396_v4  ;;  %v2564_v4 = vld [vmem:[%s3534_s19 + $0x170] sm:$0xff] }
 0x6ca   : > { %2914 = vmatprep.subr.bf16.mxu0 %v2904_v28 }
 0x6cd   : > { %2916 = vmatpush3.bf16.msra.mxu0 %v2904_v28  ;;  %v2560_v28 = vld [vmem:[%s3534_s19 + $0x150] sm:$0xff] }
 0x6d0   : > { %2835 = vmatmul.mubr.msk.f32.vlgmr.msra.gmra.mrb[20].mxu0 %vm700_vm0, %v4397_v40  ;;  %v4415_v40 = vld [vmem:[#allocation20_spill] sm:$0xff] }
 0x6d1   : > { %2837 = vmatprep.mubr.msk.f32.mxu0 %vm700_vm0, %v4398_v27  ;;  %v2037_v27 = vmul.f32 %v4077_v7, %v4415_v40  ;;  %v4427_v40 = vld [vmem:[#allocation22_spill] sm:$0xff] }
 0x6d4   : > { %2838 = vmatmul.mubr.msk.f32.gmra.mrb[22].mxu0 %vm700_vm0, %v4399_v39  ;;  %v4416_v39 = vld [vmem:[#allocation26_spill] sm:$0xff] }
 0x6d5   : > { %2840 = vmatprep.mubr.msk.f32.mxu0 %vm700_vm0, %v4400_v62  ;;  %v2040_v62 = vmul.f32 %v4077_v7, %v4416_v39 }
 0x6d8   : > { %2841 = vmatmul.mubr.msk.f32.gmra.mrb[24].mxu0 %vm700_vm0, %v4401_v47  ;;  %v2044_v47 = vadd.f32 %v2558_v43, %v2032_v18  ;;  %v4418_v43 = vld [vmem:[#allocation28_spill] sm:$0xff] }
 0x6d9   : > { %2843 = vmatprep.mubr.msk.f32.mxu0 %vm700_vm0, %v4402_v58  ;;  %v2563_v58 = vld [vmem:[%s3534_s19 + $0x168] sm:$0xff]  ;;  %v2042_v1 = vmul.f32 %v4077_v7, %v4418_v43 }
 0x6da   : > { %v2049_v42 = vadd.f32 %v2563_v58, %v2037_v27 }
 0x6dc   : > { %2844 = vmatmul.mubr.msk.f32.gmra.mrb[26].mxu0 %vm700_vm0, %v4403_v26  ;;  %v2566_v26 = vld [vmem:[%s3534_s19 + $0x180] sm:$0xff] }
 0x6dd   : > { %2846 = vmatprep.mubr.msk.f32.mxu0 %vm700_vm0, %v4404_v44  ;;  %v2052_v18 = vadd.f32 %v2566_v26, %v2040_v62 }
 0x6e0   : > { %2847 = vmatmul.mubr.msk.f32.gmra.mrb[28].mxu0 %vm700_vm0, %v4405_v33  ;;  %v2043_v33 = vadd.f32 %v2557_v23, %v2031_v22  ;;  %v4419_v23 = vld [vmem:[#allocation27_spill] sm:$0xff] }
 0x6e1   : > { %2849 = vmatprep.mubr.msk.f32.mxu0 %vm700_vm0, %v4406_v10  ;;  %v2046_v10 = vadd.f32 %v2560_v28, %v2034_v57  ;;  %v2041_v22 = vmul.f32 %v4077_v7, %v4419_v23  ;;  %v4420_v57 = vld [vmem:[#allocation11_spill] sm:$0xff] }
 0x6e4   : > { %2850 = vmatmul.mubr.msk.f32.gmra.mrb[30].mxu0 %vm700_vm0, %v4407_v16  ;;  %v2045_v16 = vadd.f32 %v2559_v25, %v2033_v56  ;;  %v4423_v25 = vld [vmem:[#allocation14_spill] sm:$0xff] }
 0x79b   : > { %v2020_v5 = vpop.f32.mrb[18].mxu0 }
 0x79c   : > { %v2024_v52 = vadd.f32 %v2020_v5, %v1949_v55  ;;  %v2825_v45 = vpop.f32.mrb[19].mxu0  ;;  %v2048_v5 = vadd.f32 %v2562_v19, %v2036_v12 }
 0x79e   : > { %v2571_v53 = vmul.f32 -1.442695, %v2024_v52 }
 0x7a0   : > { %3103 = vpow2.f32 %v2571_v53  ;;  %v2047_v53 = vadd.f32 %v2561_v15, %v2035_v36  ;;  %v4426_v15 = vld [vmem:[#allocation24_spill] sm:$0xff] }
 0x7a3   : > { %v4107_v35 = vpop.f32.mrb[20].mxu0 }
 0x7a4   : > { %v4109_v37 = vpop.f32.mrb[21].mxu0 }
 0x7a7   : > { %v4111_v0 = vpop.f32.mrb[22].mxu0 }
 0x7a8   : > { %v4113_v8 = vpop.f32.mrb[23].mxu0 }
 0x7aa   : > { %v3104_v29 = vpop.eup %3103 }
 0x7ab   : > { %v2028_v24 = vadd.f32 1.0, %v3104_v29  ;;  %v2842_v13 = vpop.f32.mrb[24].mxu0  ;;  %v2050_v29 = vadd.f32 %v2564_v4, %v2038_v11 }
 0x7ac   : > { %v2169_v6 = vpop.f32.mrb[25].mxu0 }
 0x7ad   : > { %3105 = vrcp.f32 %v2028_v24  ;;  %v4417_v24 = vld [vmem:[#allocation25_spill] sm:$0xff] }
 0x7ae   : > { %v2039_v41 = vmul.f32 %v4077_v7, %v4417_v24 }
 0x7af   : > { %v2845_v3 = vpop.f32.mrb[26].mxu0 }
 0x7b0   : > { %v2179_v54 = vpop.f32.mrb[27].mxu0 }
 0x7b3   : > { %v4127_v61 = vpop.f32.mrb[28].mxu0 }
 0x7b4   : > { %v4136_v55 = vpop.f32.mrb[29].mxu0 }
 0x7b7   : > { %v3106_v44 = vpop.eup %3105  ;;  %v4146_v52 = vpop.f32.mrb[30].mxu0 }
 0x7b8   : > { %v2058_v45 = vrot.slane %v3106_v44, %v4394_v21  ;;  %v4151_v46 = vpop.f32.mrb[31].mxu0  ;;  %v4422_v21 = vld [vmem:[#allocation15_spill] sm:$0xff] }
 0x7ba   : > { %v2060_v56 = vmul.f32 %v2058_v45, %v4420_v57  ;;  %v2059_v12 = vmul.f32 %v2058_v45, %v4421_v14  ;;  %v2062_v28 = vmul.f32 %v2058_v45, %v4422_v21  ;;  %v2061_v19 = vmul.f32 %v2058_v45, %v4423_v25  ;;  %v2565_v25 = vld [vmem:[%s3534_s19 + $0x178] sm:$0xff] }
 0x7bb   : > { %v2064_v36 = vmul.f32 %v2058_v45, %v4424_v38  ;;  %v2063_v11 = vmul.f32 %v2058_v45, %v4425_v51  ;;  %v2066_v4 = vmul.f32 %v2058_v45, %v4426_v15  ;;  %v2065_v27 = vmul.f32 %v2058_v45, %v4427_v40 }
 0x7bc   : > { %v2072_v39 = vadd.f32 %v2060_v56, %v2044_v47  ;;  %v2071_v62 = vadd.f32 %v2059_v12, %v2043_v33  ;;  %v2074_v7 = vadd.f32 %v2062_v28, %v2046_v10  ;;  %v2073_v58 = vadd.f32 %v2061_v19, %v2045_v16  ;;  %v2568_v10 = vld [vmem:[%s3534_s19 + $0x190] sm:$0xff]  ;;  %v2567_v12 = vld [vmem:[%s3534_s19 + $0x188] sm:$0xff]  ;;  %s3166_s19 = scalar_lea.vmem %s3165_s14, 128 }
 0x7bd   : > { %v2076_v26 = vadd.f32 %v2064_v36, %v2048_v5  ;;  %v2075_v44 = vadd.f32 %v2063_v11, %v2047_v53  ;;  %v2078_v24 = vadd.f32 %v2066_v4, %v2050_v29  ;;  %v2077_v43 = vadd.f32 %v2065_v27, %v2049_v42  ;;  %p3168_p1 = scmp.lt.s32.totalorder %s3166_s19, %s3160_s9 }
 0x7be   : > { %v2209_v23 = vadd.f32 %v4107_v35, %v2072_v39  ;;  %v2208_v57 = vadd.f32 %v4109_v37, %v2071_v62  ;;  %v2211_v14 = vadd.f32 %v4111_v0, %v2074_v7  ;;  %v2210_v21 = vadd.f32 %v4113_v8, %v2073_v58 }
 0x7bf   : > { %v2237_v38 = vadd.f32 %v2842_v13, %v2076_v26  ;;  %v2236_v47 = vadd.f32 %v2169_v6, %v2075_v44  ;;  %v2239_v33 = vadd.f32 %v2845_v3, %v2078_v24  ;;  %v2238_v56 = vadd.f32 %v2179_v54, %v2077_v43  ;;  %p3169_p2 = por %p3168_p1, %p3167_p0 }
 0x7c0   : > { %v2585_v16 = vmul.f32 -1.442695, %v2209_v23  ;;  %v2584_v5 = vmul.f32 -1.442695, %v2208_v57  ;;  %v2587_v53 = vmul.f32 -1.442695, %v2211_v14  ;;  %v2068_v29 = vmul.f32 %v2058_v45, %v3661_v59 }
 0x7c1   : > { %v2586_v42 = vmul.f32 -1.442695, %v2210_v21  ;;  %v2051_v35 = vadd.f32 %v2565_v25, %v2039_v41  ;;  %v2067_v37 = vmul.f32 %v2058_v45, %v3651_v32  ;;  %v2054_v28 = vadd.f32 %v2568_v10, %v2042_v1  ;;  %p3170_p3 = pnand %p3169_p2, %p3163_p13 }
 0x7c2   : > { %3107 = vpow2.f32 %v2585_v16  ;;  %v2080_v0 = vadd.f32 %v2068_v29, %v2052_v18  ;;  %v2053_v8 = vadd.f32 %v2567_v12, %v2041_v22  ;;  %v2070_v6 = vmul.f32 %v2058_v45, %v3682_v30 }
 0x7c3   : > { %3109 = vpow2.f32 %v2584_v5  ;;  %v2079_v13 = vadd.f32 %v2067_v37, %v2051_v35  ;;  %v2069_v3 = vmul.f32 %v2058_v45, %v3672_v48  ;;  %v2589_v54 = vmul.f32 -1.442695, %v2237_v38 }
 0x7c4   : > { %3111 = vpow2.f32 %v2587_v53  ;;  %v2082_v19 = vadd.f32 %v2070_v6, %v2054_v28  ;;  %v2588_v59 = vmul.f32 -1.442695, %v2236_v47  ;;  %v2591_v51 = vmul.f32 -1.442695, %v2239_v33 }
 0x7c5   : > { %3113 = vpow2.f32 %v2586_v42  ;;  %v2081_v36 = vadd.f32 %v2069_v3, %v2053_v8  ;;  %v2590_v41 = vmul.f32 -1.442695, %v2238_v56  ;;  %v2265_v58 = vadd.f32 %v4127_v61, %v3666_v31 }
 0x7c6   : > { %3115 = vpow2.f32 %v2589_v54  ;;  %v2264_v24 = vadd.f32 %v4136_v55, %v3664_v20  ;;  %v2267_v57 = vadd.f32 %v4146_v52, %v3704_v9  ;;  %v2266_v25 = vadd.f32 %v4151_v46, %v3687_v60 }
 0x7c7   : > { %3117 = vpow2.f32 %v2588_v59 }
 0x7c8   : > { %3119 = vpow2.f32 %v2591_v51 }
 0x7c9   : > { %3121 = vpow2.f32 %v2590_v41 }
 0x7cc   : > { %v3108_v32 = vpop.eup %3107 }
 0x7cd   : > { %v3110_v18 = vpop.eup %3109  ;;  %v2225_v1 = vadd.f32 1.0, %v3108_v32 }
 0x7ce   : > { %v3112_v22 = vpop.eup %3111  ;;  %v2224_v11 = vadd.f32 1.0, %v3110_v18 }
 0x7cf   : > { %v3114_v30 = vpop.eup %3113  ;;  %3123 = vrcp.f32 %v2225_v1  ;;  %v2227_v48 = vadd.f32 1.0, %v3112_v22 }
 0x7d0   : > { %3125 = vrcp.f32 %v2224_v11  ;;  %v2226_v45 = vadd.f32 1.0, %v3114_v30  ;;  %v3116_v15 = vpop.eup %3115 }
 0x7d1   : > { %3127 = vrcp.f32 %v2227_v48  ;;  %v3118_v4 = vpop.eup %3117  ;;  %v2253_v39 = vadd.f32 1.0, %v3116_v15 }
 0x7d2   : > { %3129 = vrcp.f32 %v2226_v45  ;;  %v3120_v40 = vpop.eup %3119  ;;  %v2252_v62 = vadd.f32 1.0, %v3118_v4 }
 0x7d3   : > { %v3122_v27 = vpop.eup %3121  ;;  %v2255_v7 = vadd.f32 1.0, %v3120_v40  ;;  %3131 = vrcp.f32 %v2253_v39 }
 0x7d4   : > { %v2254_v44 = vadd.f32 1.0, %v3122_v27  ;;  %3133 = vrcp.f32 %v2252_v62 }
 0x7d5   : > { %3135 = vrcp.f32 %v2255_v7 }
 0x7d6   : > { %3137 = vrcp.f32 %v2254_v44 }
 0x7d9   : > { %v3124_v26 = vpop.eup %3123 }
 0x7da   : > { %v3126_v43 = vpop.eup %3125  ;;  %v2269_v23 = vmul.f32 %v3124_v26, %v2265_v58 }
 0x7db   : > { %v3128_v14 = vpop.eup %3127  ;;  %v2268_v21 = vmul.f32 %v3126_v43, %v2264_v24 }
 0x7dc   : > { %v3130_v38 = vpop.eup %3129  ;;  %v2273_v31 = vadd.f32 %v2269_v23, %v2080_v0  ;;  %v2271_v61 = vmul.f32 %v3128_v14, %v2267_v57 }
 0x7dd   : > { %v2272_v47 = vadd.f32 %v2268_v21, %v2079_v13  ;;  %v2270_v33 = vmul.f32 %v3130_v38, %v2266_v25  ;;  %v3132_v9 = vpop.eup %3131 }
 0x7de   : > { %3139 = vtanh.f32 %v2273_v31  ;;  %v2275_v20 = vadd.f32 %v2271_v61, %v2082_v19  ;;  %v3134_v52 = vpop.eup %3133  ;;  %v2281_v12 = vsub.f32 1.0, %v3132_v9  ;;  %v2289_v53 = vmul.f32 %v3132_v9, %v4052_v2 }
 0x7df   : > { %3141 = vtanh.f32 %v2272_v47  ;;  %v2274_v55 = vadd.f32 %v2270_v33, %v2081_v36  ;;  %v3136_v56 = vpop.eup %3135  ;;  %v2280_v60 = vsub.f32 1.0, %v3134_v52  ;;  %v2288_v37 = vmul.f32 %v3134_v52, %v4055_v49  ;;  %v3159_v49 = vld [vmem:[%s4256_s8] sm:$0x1] }
 0x7e0   : > { %3143 = vtanh.f32 %v2275_v20  ;;  %v3138_v10 = vpop.eup %3137  ;;  %v2283_v29 = vsub.f32 1.0, %v3136_v56  ;;  %v2291_v6 = vmul.f32 %v3136_v56, %v4058_v50 }
 0x7e1   : > { %3145 = vtanh.f32 %v2274_v55  ;;  %v2282_v0 = vsub.f32 1.0, %v3138_v10  ;;  %v2290_v19 = vmul.f32 %v3138_v10, %v4062_v17 }
 0x7e8   : > { %v3140_v16 = vpop.eup %3139 }
 0x7e9   : > { %v3142_v46 = vpop.eup %3141  ;;  %v2285_v5 = vmul.f32 %v3140_v16, %v2281_v12 }
 0x7ea   : > { %v3144_v42 = vpop.eup %3143  ;;  %v2284_v35 = vmul.f32 %v3142_v46, %v2280_v60 }
 0x7eb   : > { %v3146_v28 = vpop.eup %3145  ;;  %v2293_v8 = vadd.f32 %v2289_v53, %v2285_v5  ;;  %v2287_v13 = vmul.f32 %v3144_v42, %v2283_v29 }
 0x7ec   : > { %v2292_v3 = vadd.f32 %v2288_v37, %v2284_v35  ;;  %v2286_v54 = vmul.f32 %v3146_v28, %v2282_v0 }
 0x7ed   : > { %v2295_v36 = vadd.f32 %v2291_v6, %v2287_v13 }
 0x7ee   : > { %v2918_v2 = vpack.c.bf16 %v2293_v8, %v2292_v3  ;;  %v2294_v59 = vadd.f32 %v2290_v19, %v2286_v54 }
 0x7f0   : > { %2919 = vmatpush3.bf16.msra.mxu1 %v2918_v2  ;;  %v2921_v51 = vpack.c.bf16 %v2295_v36, %v2294_v59 }
 0x7f1   : > { %2920 = vmatprep.subr.bf16.mxu1 %v4347_v63 }
 0x7f4   : > { %2922 = vmatpush3.bf16.msra.mxu1 %v2921_v51 }
 0x7f7   : > { %2861 = vmatmul.mubr.msk.f32.vlgmr.msra.gmra.mrb[30].mxu1 %vm700_vm0, %v3159_v49 }
 0x8ca   : > { %v2362_v50 = vpop.f32.mrb[30].mxu1 }
 0x8cb   : > { %v2363_v17 = vadd.f32 %v2362_v50, %v4362_v34  ;;  %v2862_v41 = vpop.f32.mrb[31].mxu1 }
 0x8cd   : > { %2593 = vst.msk [vmem:[%s3738_s28 + $0x3] sm:$0x1] %vm1052_vm3, %v2363_v17 }
 0x8ce   : > { %3173 = shalt.err (!%p3170_p3)
}
 0x8cf   : > { %s3174_s26 = scalar_lea.hbm %s4201_s11, 64  ;;  %s3178_s27 = scalar_lea.hbm %s4258_s10, 128 }
 0x8d0   : > { %p3175_p4 = scmp.ne.s32.totalorder %s4201_s11, %s3174_s26  ;;  %p3179_p9 = scmp.lt.u32.totalorder %s4201_s11, %s4258_s10 }
 0x8d1   : > { %p3180_p10 = scmp.lt.u32.totalorder %s3178_s27, %s3174_s26  ;;  %p3182_p12 = scmp.lt.u32.totalorder %s3174_s26, %s4201_s11 }
 0x8d2   : > { %p3176_p7 = pnand %p3175_p4, %p3327_p5 }
 0x8d3   : > { %p3181_p11 = por %p3180_p10, %p3179_p9 }
 0x8d4   : > { %p3177_p8 = pneg %p3176_p7 }
 0x8d5   : > { %p3183_p13 = por %p3182_p12, %p3181_p11 }
 0x8d7   : > { %p3184_p0 = pnand %p3183_p13, %p3177_p8 }
 0x8d9   : > { %3187 = shalt.err (!%p3184_p0)
}
 0x8da   : > { %s3229_s9 = smov 16   ;;  %s3230_s13 = smov 1  }
 0x8db   : > { %2924 = dma.vmem_to_hbm [thread:$0]  (%p3327_p5), %s4195_s22, 64, %s4201_s11, %s4207_s12, %s3229_s9, %s3229_s9, %s3230_s13  }
 0x8dc PF: > { %p2930_p1 = scmp.ge.s32.totalorder %s3222_s18, 2  ;;  %s2397_s14 = sand.u32 1, %s3210_s15  }
 0x8dd   : > { %s2398_s19 = scalar_lea.sflag [#allocation4], %s2397_s14 }
 0x8de   : > { %p2927_p2 = pnand %p2930_p1, %p3331_p6 }
 0x8e0   : > { %3205 = dma.done.wait (!%p2927_p2), %s2398_s19, 64  }
 0x8e1   : > { %3207 = vsyncadd (!%p2927_p2), %s2398_s19, 4294967232  ;;  %p22_p3 = scmp.ge.s32.totalorder %s3314_s20, 4   ;;  %s4428_s15 = smov %s3214_s16 }
 0x8e2   : > { %s4429_s16 = smov %s3218_s17  ;;  %s4430_s17 = smov %s3325_s23 }
 0x8e3   : > { %s4431_s18 = smov %s3314_s20  ;;  %24 = sbr.rel (!%p22_p3) target bundleno = 6 (0x6), region = 104 }
 0x8ea   :  { %2403 = vsyncpa [#allocation4], 1 }
 0x8eb   :  { %2405 = vsyncpa [#allocation4 + $0x1], 1 }

</bundles_post_ra>
